<compile_context>
chip_gen: v6e
topology: v6e:2x2x1
jax: 0.10.0
libtpu: 0.0.40
codegen_flags: <defaults>
</compile_context>

<pallas_src>
import functools

import jax
import jax.numpy as jnp
import numpy as np
from jax.experimental import pallas as pl
from jax.experimental.pallas import tpu as pltpu

_LANE = 128      # lane width (last dim)
_SUBLANE = 8     # sublane width (second-to-last dim)


def _round_up(n, m):
    return ((n + m - 1) // m) * m


def _pad_axis(a, axis, new_size):
    pad = new_size - a.shape[axis]
    if pad == 0:
        return a
    widths = [(0, 0)] * a.ndim
    widths[axis] = (0, pad)
    return jnp.pad(a, widths)


def _vmem_ceiling_bytes():
    """Per-generation VMEM ceiling: physical capacity minus ~8 MiB headroom."""
    cap = 64 << 20                                   # conservative fallback (v7x)
    try:
        info = pltpu.get_tpu_info()
        cap = int(getattr(info, "vmem_capacity_bytes", cap))
    except Exception:
        pass
    return max(cap - (8 << 20), 32 << 20)


def _vmem_limit_bytes(needed_bytes):
    # Generous (2x + slack) so the compiler never de-pipelines, clamped to the
    # per-generation ceiling (56 MiB on v7x, ~120 MiB on v5e/v6e).
    return int(min(max(2 * needed_bytes + (4 << 20), 32 << 20), _vmem_ceiling_bytes()))


def _row_tile(B, tm):
    """Row tile: big (amortize per-step overhead), sublane-aligned, and giving
    >=2 grid steps whenever possible so "parallel" splits across v7x's 2 TCs."""
    half = _round_up(pl.cdiv(B, 2), _SUBLANE)
    return max(_SUBLANE, min(tm, half))


@functools.lru_cache(maxsize=None)
def _single_buffer_supported():
    """Probe whether BlockSpec(pipeline_mode=pl.Buffered(1)) lowers on this jax/TPU."""
    try:
        def _k(x_ref, o_ref):
            o_ref[...] = x_ref[...] + 1.0

        f = pl.pallas_call(
            _k,
            out_shape=jax.ShapeDtypeStruct((8, 128), jnp.float32),
            grid=(2,),
            in_specs=[pl.BlockSpec((8, 128), lambda i: (0, 0),
                                   pipeline_mode=pl.Buffered(1))],
            out_specs=pl.BlockSpec((8, 128), lambda i: (0, 0)),
        )
        jax.block_until_ready(f(jnp.zeros((8, 128), jnp.float32)))
        return True
    except Exception:
        return False


def _resident_spec(block_shape, index_map):
    """BlockSpec for a grid-resident (constant index_map) operand: single-buffer
    it when supported; otherwise fall back to the default (double-buffered)."""
    if _single_buffer_supported():
        return pl.BlockSpec(block_shape, index_map, pipeline_mode=pl.Buffered(1))
    return pl.BlockSpec(block_shape, index_map)


def _weight_buffers():
    return 1 if _single_buffer_supported() else 2


# ---------------------------------------------------------------------------
# One-time parameter preparation (transpose / optional lane-pad / optional cast).
# Do NOT call this per forward pass.
# ---------------------------------------------------------------------------
def prepare_siren_params(weight, bias, *, param_dtype=None):
    """weight: (out_f, in_f) in PyTorch nn.Linear layout; bias: (out_f,).

    Returns (w_t, b_row, out_f) with w_t: (in_f, out_dim), b_row: (1, out_dim).
    out_dim is lane-padded only when out_f > 128 and misaligned; otherwise the
    true dim is kept (block == full dim is legal, and skipping the pad avoids a
    post-kernel slice pass). Bias stays f32 (bias add is done in f32)."""
    out_f, in_f = weight.shape
    w_t = weight.T                                   # (in_f, out_f)
    b_row = bias.reshape(1, out_f).astype(jnp.float32)
    out_dim = out_f
    if out_f > _LANE and out_f % _LANE != 0:
        out_dim = _round_up(out_f, _LANE)
        w_t = _pad_axis(w_t, 1, out_dim)
        b_row = _pad_axis(b_row, 1, out_dim)
    if param_dtype is not None:
        w_t = w_t.astype(param_dtype)
    return w_t, b_row, out_f


# ---------------------------------------------------------------------------
# Single SirenLayer: y = x @ W + b ; out = y if is_last else sin(w0 * y)
# ---------------------------------------------------------------------------
def _siren_layer_kernel(x_ref, w_ref, b_ref, o_ref, *, w0, is_last):
    x = x_ref[...]
    w = w_ref[...]
    lhs = x if x.dtype == w.dtype else x.astype(w.dtype)   # bf16 MXU fast path
    y = jnp.dot(lhs, w, preferred_element_type=jnp.float32)
    y = y + b_ref[...].astype(jnp.float32)                  # bias add in f32 (VPU)
    if not is_last:
        y = jnp.sin(w0 * y)                                  # activation in f32
    o_ref[...] = y.astype(o_ref.dtype)


def siren_layer(x, w_t, b_row, *, w0=30.0, is_last=False, tm=1024,
                out_f=None, out_dtype=None):
    """x: (B, in_f); w_t: (in_f, out_dim) prepared; b_row: (1, out_dim) prepared.

    Accepts f32 or bf16 x / w_t (cast to bf16 at the call boundary by the
    caller halves the dominant HBM traffic); accumulation is always f32."""
    B, in_f = x.shape
    assert w_t.shape[0] == in_f
    out_dim = w_t.shape[1]
    out_f = out_dim if out_f is None else out_f
    out_dtype = x.dtype if out_dtype is None else jnp.dtype(out_dtype)

    tm_eff = _row_tile(B, tm)
    grid = (pl.cdiv(B, tm_eff),)                      # ragged last block, no B pad

    wbuf = _weight_buffers()
    needed = (2 * tm_eff * in_f * x.dtype.itemsize                 # x tiles (dbl buf)
              + 2 * tm_eff * out_dim * jnp.dtype(out_dtype).itemsize  # out tiles
              + wbuf * (in_f * out_dim * w_t.dtype.itemsize
                        + out_dim * b_row.dtype.itemsize)          # resident W, b
              + tm_eff * out_dim * 4)                              # f32 temp

    kernel = functools.partial(_siren_layer_kernel, w0=float(w0),
                               is_last=bool(is_last))
    out = pl.pallas_call(
        kernel,
        out_shape=jax.ShapeDtypeStruct((B, out_dim), out_dtype),
        grid=grid,
        in_specs=[
            pl.BlockSpec((tm_eff, in_f), lambda i: (i, 0)),
            _resident_spec((in_f, out_dim), lambda i: (0, 0)),
            _resident_spec((1, out_dim), lambda i: (0, 0)),
        ],
        out_specs=pl.BlockSpec((tm_eff, out_dim), lambda i: (i, 0)),
        compiler_params=pltpu.CompilerParams(
            dimension_semantics=("parallel",),
            vmem_limit_bytes=_vmem_limit_bytes(needed),
        ),
    )(x, w_t, b_row)
    return out if out_f == out_dim else out[:, :out_f]


# ---------------------------------------------------------------------------
# Fused SIREN MLP: all layers in one pallas_call; the activation tile stays in
# VMEM between layers, only the final output is written back to HBM.
# Layers 0..L-2 apply sin(w0 * .), the final layer is linear (is_last=True).
# ---------------------------------------------------------------------------
def _siren_mlp_kernel(*refs, w0, num_layers):
    x_ref, o_ref = refs[0], refs[-1]
    param_refs = refs[1:-1]                 # (W0, b0, W1, b1, ...)
    h = x_ref[...]
    for l in range(num_layers):
        w = param_refs[2 * l][...]
        b = param_refs[2 * l + 1][...]
        lhs = h if h.dtype == w.dtype else h.astype(w.dtype)
        y = jnp.dot(lhs, w, preferred_element_type=jnp.float32)
        y = y + b.astype(jnp.float32)
        if l < num_layers - 1:
            y = jnp.sin(w0 * y)
        h = y                               # stays on-chip; never touches HBM
    o_ref[...] = h.astype(o_ref.dtype)


def siren_mlp(x, layers, *, w0=30.0, tm=512, out_f=None, out_dtype=None):
    """layers: list of prepared (w_t, b_row) with w_t[l]: (d_l, d_{l+1}).
    Final layer is linear (is_last), all earlier layers use sin(w0 * .)."""
    B, in_f = x.shape
    L = len(layers)
    dims = [in_f] + [w.shape[1] for (w, _) in layers]
    out_dim = dims[-1]
    out_f = out_dim if out_f is None else out_f
    out_dtype = x.dtype if out_dtype is None else jnp.dtype(out_dtype)

    tm_eff = _row_tile(B, tm)
    grid = (pl.cdiv(B, tm_eff),)

    wbuf = _weight_buffers()
    needed = (2 * tm_eff * in_f * x.dtype.itemsize
              + 2 * tm_eff * out_dim * jnp.dtype(out_dtype).itemsize)
    act_peak = 0
    params, in_specs = [], [pl.BlockSpec((tm_eff, in_f), lambda i: (i, 0))]
    for l, (w, b) in enumerate(layers):
        assert w.shape == (dims[l], dims[l + 1]) and b.shape == (1, dims[l + 1])
        params += [w, b]
        in_specs += [
            _resident_spec((dims[l], dims[l + 1]), lambda i: (0, 0)),
            _resident_spec((1, dims[l + 1]), lambda i: (0, 0)),
        ]
        needed += wbuf * (w.size * w.dtype.itemsize + b.size * b.dtype.itemsize)
        # two adjacent activations live at a time (f32): take the max, not sum
        act_peak = max(act_peak, tm_eff * (dims[l] + dims[l + 1]) * 4)
    needed += act_peak

    kernel = functools.partial(_siren_mlp_kernel, w0=float(w0), num_layers=L)
    out = pl.pallas_call(
        kernel,
        out_shape=jax.ShapeDtypeStruct((B, out_dim), out_dtype),
        grid=grid,
        in_specs=in_specs,
        out_specs=pl.BlockSpec((tm_eff, out_dim), lambda i: (i, 0)),
        compiler_params=pltpu.CompilerParams(
            dimension_semantics=("parallel",),
            vmem_limit_bytes=_vmem_limit_bytes(needed),
        ),
    )(x, *params)
    return out if out_f == out_dim else out[:, :out_f]


# ---------------------------------------------------------------------------
# SIREN init matching the PyTorch module (nn.Linear layout: weight (out_f, in_f)).
# ---------------------------------------------------------------------------
def init_siren_params(key, in_f, out_f, *, w0=30.0, is_first=False):
    kw, kb = jax.random.split(key)
    b = (1.0 / in_f) if is_first else (np.sqrt(6.0 / in_f) / w0)
    weight = jax.random.uniform(kw, (out_f, in_f), jnp.float32, -b, b)
    bound = 1.0 / np.sqrt(in_f)              # nn.Linear default bias init
    bias = jax.random.uniform(kb, (out_f,), jnp.float32, -bound, bound)
    return weight, bias


if __name__ == "__main__":
    key = jax.random.PRNGKey(0)
    k_x, k0, k1, k2 = jax.random.split(key, 4)

    # SIREN-typical small shapes: 2-D coordinate input, ragged batch, hidden
    # widths that are NOT multiples of 128 — exercises full-dim blocks, the
    # ragged last batch tile, and the no-pad fast paths.
    B, w0 = 200, 30.0
    in_f, h1, h2, out_f = 2, 48, 64, 3

    x = jax.random.normal(k_x, (B, in_f), jnp.float32)

    w0_py, b0_py = init_siren_params(k0, in_f, h1, w0=w0, is_first=True)
    w1_py, b1_py = init_siren_params(k1, h1, h2, w0=w0)
    w2_py, b2_py = init_siren_params(k2, h2, out_f, w0=w0)

    # One-time parameter preparation (transpose / pad / cast) — outside the
    # per-call path, so no per-forward HBM round-trips of the weights.
    w0_t, b0_r, _ = prepare_siren_params(w0_py, b0_py)
    w1_t, b1_r, _ = prepare_siren_params(w1_py, b1_py)
    w2_t, b2_r, _ = prepare_siren_params(w2_py, b2_py)

    # ---- single SirenLayer (f32), matches the PyTorch forward ----
    out = siren_layer(x, w0_t, b0_r, w0=w0, is_last=False)
    out = jax.block_until_ready(out)
    ref = jnp.sin(w0 * (x @ w0_py.T + b0_py))
    np.testing.assert_allclose(np.asarray(out), np.asarray(ref),
                               rtol=5e-5, atol=5e-5)

    # ---- single SirenLayer with is_last=True (pure linear) ----
    out_last = jax.block_until_ready(
        siren_layer(x, w0_t, b0_r, w0=w0, is_last=True))
    np.testing.assert_allclose(np.asarray(out_last),
                               np.asarray(x @ w0_py.T + b0_py),
                               rtol=5e-5, atol=5e-5)

    # ---- bf16 I/O path: bf16 activations + bf16 weights, f32 accumulation ----
    wb_t, bb_r, _ = prepare_siren_params(w1_py, b1_py, param_dtype=jnp.bfloat16)
    h_bf = ref.astype(jnp.bfloat16)                     # bf16 at the call boundary
    out_bf = jax.block_until_ready(
        siren_layer(h_bf, wb_t, bb_r, w0=w0, is_last=False,
                    out_dtype=jnp.bfloat16))
    ref_bf = jnp.sin(w0 * (jnp.dot(h_bf, w1_py.T.astype(jnp.bfloat16),
                                   preferred_element_type=jnp.float32) + b1_py))
    np.testing.assert_allclose(np.asarray(out_bf, dtype=np.float32),
                               np.asarray(ref_bf, dtype=np.float32),
                               rtol=2e-2, atol=2e-2)

    # ---- fused 3-layer SIREN MLP (sin, sin, linear) in one pallas_call ----
    mlp_out = jax.block_until_ready(
        siren_mlp(x, [(w0_t, b0_r), (w1_t, b1_r), (w2_t, b2_r)], w0=w0))
    h = jnp.sin(w0 * (x @ w0_py.T + b0_py))
    h = jnp.sin(w0 * (h @ w1_py.T + b1_py))
    mlp_ref = h @ w2_py.T + b2_py                        # last layer linear
    np.testing.assert_allclose(np.asarray(mlp_out), np.asarray(mlp_ref),
                               rtol=2e-4, atol=2e-4)

    print("KERNEL_OK")
</pallas_src>

<mosaic_0001>
module attributes {stable_mosaic.version = 11 : i64} {
  func.func @_k(%arg0: i32, %arg1: memref<8x128xf32, #tpu.memory_space<vmem>>, %arg2: memref<8x128xf32, #tpu.memory_space<vmem>>) attributes {dimension_semantics = [#tpu.dimension_semantics<arbitrary>], iteration_bounds = array<i64: 2>, scalar_prefetch = 0 : i64, scratch_operands = 0 : i64, tpu.core_type = #tpu.core_type<tc>, window_params = [{pipeline_mode = #tpu.pipeline_mode<synchronous>, transform_indices = @transform_0, window_bounds = array<i64: 8, 128>}, {pipeline_mode = #tpu.pipeline_mode<synchronous>, transform_indices = @transform_1, window_bounds = array<i64: 8, 128>}]} {
    %c0 = arith.constant 0 : index
    %c0_0 = arith.constant 0 : index
    %0 = vector.load %arg1[%c0, %c0_0] : memref<8x128xf32, #tpu.memory_space<vmem>>, vector<8x128xf32>
    %cst = arith.constant 1.000000e+00 : f32
    %1 = vector.broadcast %cst : f32 to vector<8x128xf32>
    %2 = arith.addf %0, %1 : vector<8x128xf32>
    %c0_1 = arith.constant 0 : index
    %c0_2 = arith.constant 0 : index
    %3 = vector.load %arg2[%c0_1, %c0_2] : memref<8x128xf32, #tpu.memory_space<vmem>>, vector<8x128xf32>
    tpu.vector_store %arg2[%c0_1, %c0_2], %2 {strides = array<i32>} : memref<8x128xf32, #tpu.memory_space<vmem>>, vector<8x128xf32>,
    return
  }
  func.func @transform_0(%arg0: i32) -> (i32, i32) {
    %c0_i32 = arith.constant 0 : i32
    %c0_i32_0 = arith.constant 0 : i32
    %c0_i32_1 = arith.constant 0 : i32
    return %c0_i32, %c0_i32_0 : i32, i32
  }
  func.func @transform_1(%arg0: i32) -> (i32, i32) {
    %c0_i32 = arith.constant 0 : i32
    %c0_i32_0 = arith.constant 0 : i32
    %c0_i32_1 = arith.constant 0 : i32
    return %c0_i32, %c0_i32_0 : i32, i32
  }
}

module attributes {stable_mosaic.version = 11 : i64} {
  func.func @_siren_layer_kernel(%arg0: i32, %arg1: memref<104x2xf32, #tpu.memory_space<vmem>>, %arg2: memref<2x48xf32, #tpu.memory_space<vmem>>, %arg3: memref<1x48xf32, #tpu.memory_space<vmem>>, %arg4: memref<104x48xf32, #tpu.memory_space<vmem>>) attributes {dimension_semantics = [#tpu.dimension_semantics<parallel>], iteration_bounds = array<i64: 2>, scalar_prefetch = 0 : i64, scratch_operands = 0 : i64, tpu.core_type = #tpu.core_type<tc>, window_params = [{transform_indices = @transform_0, window_bounds = array<i64: 104, 2>}, {pipeline_mode = #tpu.pipeline_mode<synchronous>, transform_indices = @transform_1, window_bounds = array<i64: 2, 48>}, {pipeline_mode = #tpu.pipeline_mode<synchronous>, transform_indices = @transform_2, window_bounds = array<i64: 1, 48>}, {transform_indices = @transform_3, window_bounds = array<i64: 104, 48>}]} {
    %c0 = arith.constant 0 : index
    %c0_0 = arith.constant 0 : index
    %0 = vector.load %arg1[%c0, %c0_0] : memref<104x2xf32, #tpu.memory_space<vmem>>, vector<104x2xf32>
    %c0_1 = arith.constant 0 : index
    %c0_2 = arith.constant 0 : index
    %1 = vector.load %arg2[%c0_1, %c0_2] : memref<2x48xf32, #tpu.memory_space<vmem>>, vector<2x48xf32>
    %cst = arith.constant dense<0.000000e+00> : vector<104x48xf32>
    %2 = tpu.matmul %0, %1, %cst {dimension_numbers = #tpu.dot_dimension_numbers<[1], [0], [0], [1], [0, 0, 1, 1], [], []>} : vector<104x2xf32>, vector<2x48xf32>, vector<104x48xf32> -> vector<104x48xf32>
    %c0_3 = arith.constant 0 : index
    %c0_4 = arith.constant 0 : index
    %3 = vector.load %arg3[%c0_3, %c0_4] : memref<1x48xf32, #tpu.memory_space<vmem>>, vector<1x48xf32>
    %4 = vector.broadcast %3 : vector<1x48xf32> to vector<104x48xf32>
    %5 = arith.addf %2, %4 : vector<104x48xf32>
    %cst_5 = arith.constant 3.000000e+01 : f32
    %6 = vector.broadcast %cst_5 : f32 to vector<104x48xf32>
    %7 = arith.mulf %6, %5 : vector<104x48xf32>
    %8 = math.sin %7 : vector<104x48xf32>
    %c0_6 = arith.constant 0 : index
    %c0_7 = arith.constant 0 : index
    %9 = vector.load %arg4[%c0_6, %c0_7] : memref<104x48xf32, #tpu.memory_space<vmem>>, vector<104x48xf32>
    tpu.vector_store %arg4[%c0_6, %c0_7], %8 {strides = array<i32>} : memref<104x48xf32, #tpu.memory_space<vmem>>, vector<104x48xf32>,
    return
  }
  func.func @transform_0(%arg0: i32) -> (i32, i32) {
    %c0_i32 = arith.constant 0 : i32
    %c0_i32_0 = arith.constant 0 : i32
    return %arg0, %c0_i32 : i32, i32
  }
  func.func @transform_1(%arg0: i32) -> (i32, i32) {
    %c0_i32 = arith.constant 0 : i32
    %c0_i32_0 = arith.constant 0 : i32
    %c0_i32_1 = arith.constant 0 : i32
    return %c0_i32, %c0_i32_0 : i32, i32
  }
  func.func @transform_2(%arg0: i32) -> (i32, i32) {
    %c0_i32 = arith.constant 0 : i32
    %c0_i32_0 = arith.constant 0 : i32
    %c0_i32_1 = arith.constant 0 : i32
    return %c0_i32, %c0_i32_0 : i32, i32
  }
  func.func @transform_3(%arg0: i32) -> (i32, i32) {
    %c0_i32 = arith.constant 0 : i32
    %c0_i32_0 = arith.constant 0 : i32
    return %arg0, %c0_i32 : i32, i32
  }
}

</mosaic_0001>

<bundles_post_ra>
// kernel: tpu_custom_call.1
= control target key start
LH: loop header
LB: loop body
LE: loop exit
PB: predicated region body
PF: predicated region fallthrough
CT: control target
= control target key end

     0   :  { %6 = vsyncpa [#allocation3], 0  ;;  %s305_s0 = inlined_call_operand.hbm [shape: f32[8,128], index: 0, kind: input, shape index: {}]   ;;  %s306_s1 = inlined_call_operand.hbm [shape: f32[8,128], index: 1, kind: output, shape index: {}]  }
   0x1   :  { %7 = vsyncpa [#allocation4], 0  ;;  %s258_s6 = smov 0  }
   0x2 LB: > { %s145_s7 = sadd.s32 4294967295, %s244_s6   ;;  %p146_p0 = scmp.ge.s32.totalorder %s244_s6, 1  ;;  %s244_s6 = sphi %s258_s6, %s13_s6  }
   0x3   : > { %p60_p1 = scmp.lt.s32.totalorder %s244_s6, 3  ;;  %p270_p3 = scmp.eq.s32.totalorder %s145_s7, 0 }
   0x4   : > { %s246_s10 = smov [#allocation2]  }
   0x5   : > { %p266_p2 = pnand %p146_p0, %p60_p1  ;;  %s73_s11 = sshll.u32 %s246_s10, 4  ;;  %s74_s11 = int_to_ptr.vmem [resolvable:$true] %s73_s11 }
   0x6   : > { %s191_s12 = scalar_lea.vmem %s74_s11, 128  ;;  %p199_p10 = scmp.lt.s32.totalorder %s74_s11, %s74_s11 }
   0x7   : > { %p162_p4 = pneg %p266_p2  ;;  %p192_p7 = scmp.ne.s32.totalorder %s74_s11, %s191_s12 }
   0x8   : > { %p200_p11 = scmp.lt.s32.totalorder %s191_s12, %s191_s12 }
   0x9   : > { %p163_p5 = pnand %p270_p3, %p162_p4 }
   0xa   : > { %p201_p12 = por %p200_p11, %p199_p10 }
   0xb   : > { %p182_p6 = pneg %p163_p5 }
   0xd   : > { %p194_p8 = pnand %p192_p7, %p182_p6 }
   0xf   : > { %p195_p9 = pneg %p194_p8 }
  0x11   : > { %p202_p13 = pnand %p201_p12, %p195_p9 }
  0x13   : > { %205 = shalt.err (!%p202_p13)
}
  0x14   : > { %165 = dma.hbm_to_vmem [thread:$0]  (!%p163_p5), %s305_s0, 128, %s74_s11, [#allocation3]  }
  0x15   : > { %86 = sbr.rel (%p266_p2) target bundleno = 42 (0x2a), region = 24 }
  0x1a   : > { %235 = dma.done.wait (%p270_p3), [#allocation3], 128  }
  0x1b   : > { %237 = vsyncadd (%p270_p3), [#allocation3], 4294967168  ;;  %s247_s15 = smov [#allocation5]   ;;  %v96_v0 = vld [vmem:[#allocation2] sm:$0xff]  ;;  %p287_p0 = scmp.eq.s32.totalorder %s145_s7, 1 }
  0x1c   : > { %s106_s16 = sshll.u32 %s247_s15, 4  ;;  %v97_v1 = vadd.f32 1.0, %v96_v0  ;;  %s107_s16 = int_to_ptr.vmem [resolvable:$true] %s106_s16 }
  0x1d   : > { %s206_s18 = scalar_lea.vmem %s107_s16, 128  ;;  %p213_p5 = scmp.lt.s32.totalorder %s107_s16, %s107_s16 }
  0x1e   : > { %98 = vst [vmem:[#allocation5] sm:$0xff] %v97_v1  ;;  %p207_p1 = scmp.ne.s32.totalorder %s107_s16, %s206_s18  ;;  %p214_p6 = scmp.lt.s32.totalorder %s206_s18, %s206_s18 }
  0x20   : > { %p208_p2 = pnand %p207_p1, %p287_p0  ;;  %p215_p7 = por %p214_p6, %p213_p5 }
  0x22   : > { %p209_p4 = pneg %p208_p2 }
  0x24   : > { %p216_p3 = pnand %p215_p7, %p209_p4 }
  0x26   : > { %219 = shalt.err (!%p216_p3)
}
  0x27   : > { %159 = dma.vmem_to_hbm [thread:$0]  (%p287_p0), %s107_s16, 128, %s306_s1, [#allocation4]  }
  0x28   : > { %239 = dma.done.wait (%p287_p0), [#allocation4], 128  }
  0x29   : > { %241 = vsyncadd (%p287_p0), [#allocation4], 4294967168 }
  0x2a PF: > { %s13_s6 = sadd.s32 1, %s244_s6  }
  0x2b   : > { %p10_p8 = scmp.ge.s32.totalorder %s13_s6, 4  }
  0x2d   :  { %12 = sbr.rel (!%p10_p8) target bundleno = 2 (0x2), region = 53 }
  0x32   :  { %119 = vsyncpa [#allocation3], 1 }
  0x33   :  { %121 = vsyncpa [#allocation3 + $0x1], 1 }
  0x34   :  { %122 = vsyncpa [#allocation4], 1 }
  0x35   :  { %124 = vsyncpa [#allocation4 + $0x1], 1 }

// kernel: tpu_custom_call.1
= control target key start
LH: loop header
LB: loop body
LE: loop exit
PB: predicated region body
PF: predicated region fallthrough
CT: control target
= control target key end

     0   :  { %s2497_s12 = smov 0   ;;  %s2499_s13 = smov 0   ;;  %s3639_s0 = inlined_call_operand.vmem [shape: f32[200,2], index: 0, kind: input, shape index: {}]   ;;  %s3640_s1 = inlined_call_operand.vmem [shape: f32[2,48], index: 1, kind: input, shape index: {}]   ;;  %s3641_s2 = inlined_call_operand.vmem [shape: f32[1,48], index: 2, kind: input, shape index: {}]   ;;  %s3642_s3 = inlined_call_operand.vmem [shape: f32[200,48], index: 3, kind: output, shape index: {}]  }
   0x1   :  { %s2501_s14 = smov 0  }
   0x2 LB: > { %s2510_s15 = sadd.s32 4294967295, %s2435_s14   ;;  %s2512_s16 = sadd.s32 1, %s2435_s14   ;;  %s2435_s14 = sphi %s2501_s14, %s3671_s14   ;;  %s2431_s13 = sphi %s2499_s13, %s3670_s13   ;;  %s2427_s12 = sphi %s2497_s12, %s3669_s12  }
   0x3   : > { %s85_s17 = ssub.s32 %s2435_s14, %s2512_s16  ;;  %s88_s18 = sadd.s32 1, %s2431_s13 }
   0x4   : > { %p86_p0 = scmp.eq.s32.totalorder %s85_s17, 0  ;;  %p98_p1 = scmp.ne.s32.totalorder %s2431_s13, %s2427_s12 }
   0x5   : > { %p99_p2 = scmp.eq.s32.totalorder %s2510_s15, 1  ;;  %p2035_p3 = scmp.ge.s32.totalorder %s2435_s14, 1 }
   0x6   : > { %s2520_s19 = scalar_select %p86_p0, %s2431_s13, %s88_s18  }
   0x7   : > { %p2522_p4 = por %p99_p2, %p98_p1  ;;  %p146_p5 = scmp.lt.s32.totalorder %s2435_s14, 3 }
   0x9   : > { %p147_p6 = pnand %p2035_p3, %p146_p5 }
   0xa   : > { %s2530_s23 = smul.u32 (!%p147_p6), 13, %s2510_s15  ;;  %s170_s4 = sand.u32 (!%p147_p6), 1, %s2427_s12  }
   0xb   : > { %150 = sbr.rel (%p147_p6) target bundleno = 635 (0x27b), region = 32 }
   0xc   : > { %p178_p7 = scmp.lt.s32.totalorder (!%p147_p6), %s2530_s23, 24  ;;  %s2837_s5 = smul.u32 (!%p147_p6), 104, %s170_s4 }
   0xe   : > { %s2867_s6 = scalar_lea.vmem (!%p147_p6), [#allocation2], %s2837_s5  }
  0x10   : > { %v205_v0 = vld [vmem:[%s3640_s1] sm:$0x3]  ;;  %vm253_vm0 = vcmask 1041408   ;;  %v2469_v1 = vmov 0.0   ;;  %vm2470_vm1 = vmmov 0   ;;  %s179_s24 = scalar_select %p178_p7, %s2530_s23, 24 }
  0x11   : > { %2131 = vmatprep.subr.mxu0 %v2469_v1  ;;  %2172 = vmatprep.subr.mxu1 %v2469_v1  ;;  %vm213_vm2 = vcmask 15360   ;;  %v2581_v15 = vld [vmem:[%s3641_s2] ss:$0 sm:$0xff]  ;;  %s1774_s9 = ssub.s32 (%p2522_p4), 25, %s2530_s23  ;;  %s2116_s10 = smul.u32 (%p2522_p4), 104, %s2510_s15 }
  0x12   : > { %2132 = vmatpush3.msk.msra.mxu0 %vm253_vm0, %v205_v0  ;;  %2173 = vmatpush3.msk.msra.mxu1 %vm253_vm0, %v205_v0  ;;  %s2036_s25 = sshll.u32 %s179_s24, 3  ;;  %v2471_v0 = vmov 683565275   ;;  %p1775_p8 = scmp.lt.s32.totalorder (%p2522_p4), %s1774_s9, 13 }
  0x13   : > { %2133 = vmatprep.mubr.msk.f32.mxu0 %vm2470_vm1, %v2469_v1  ;;  %2154 = vmatprep.mubr.msk.f32.mxu1 %vm2470_vm1, %v2469_v1  ;;  %s2539_s28 = scalar_lea.vmem %s3639_s0, %s2036_s25  ;;  %s3557_s14 = scalar_lea.vmem (%p2522_p4), %s3642_s3, %s2116_s10  }
  0x14   : > { %v192_v2 = vld [vmem:[%s2539_s28] sm:$0xff]  ;;  %v199_v3 = vld [vmem:[%s2539_s28 + $0x38] sm:$0xff]  ;;  %v193_v4 = vld [vmem:[%s2539_s28 + $0x8] sm:$0xff] }
  0x15   : > { %2134 = vmatmul.mubr.msk.f32.vlgmr.msra.gmra.mxu0 %vm213_vm2, %v192_v2  ;;  %2155 = vmatmul.mubr.msk.f32.vlgmr.msra.gmra.mxu1 %vm213_vm2, %v199_v3  ;;  %v200_v5 = vld [vmem:[%s2539_s28 + $0x40] sm:$0xff]  ;;  %v194_v6 = vld [vmem:[%s2539_s28 + $0x10] sm:$0xff]  ;;  %v201_v7 = vld [vmem:[%s2539_s28 + $0x48] sm:$0xff] }
  0x16   : > { %2136 = vmatprep.mubr.msk.f32.mxu0 %vm2470_vm1, %v2469_v1  ;;  %2157 = vmatprep.mubr.msk.f32.mxu1 %vm2470_vm1, %v2469_v1  ;;  %v195_v8 = vld [vmem:[%s2539_s28 + $0x18] sm:$0xff]  ;;  %v202_v9 = vld [vmem:[%s2539_s28 + $0x50] sm:$0xff]  ;;  %v196_v10 = vld [vmem:[%s2539_s28 + $0x20] sm:$0xff] }
  0x17   : > { %v203_v11 = vld [vmem:[%s2539_s28 + $0x58] sm:$0xff]  ;;  %v197_v12 = vld [vmem:[%s2539_s28 + $0x28] sm:$0xff]  ;;  %v204_v13 = vld [vmem:[%s2539_s28 + $0x60] sm:$0xff] }
  0x18   : > { %v198_v14 = vld [vmem:[%s2539_s28 + $0x30] sm:$0xff] }
  0x19   : > { %2137 = vmatmul.mubr.msk.f32.gmra.mxu0 %vm213_vm2, %v193_v4  ;;  %2158 = vmatmul.mubr.msk.f32.gmra.mxu1 %vm213_vm2, %v200_v5  ;;  %v2472_v4 = vmov 2475754826  }
  0x1a   : > { %2139 = vmatprep.mubr.msk.f32.mxu0 %vm2470_vm1, %v2469_v1  ;;  %2160 = vmatprep.mubr.msk.f32.mxu1 %vm2470_vm1, %v2469_v1 }
  0x1d   : > { %2140 = vmatmul.mubr.msk.f32.gmra.mxu0 %vm213_vm2, %v194_v6  ;;  %2161 = vmatmul.mubr.msk.f32.gmra.mxu1 %vm213_vm2, %v201_v7  ;;  %v2473_v6 = vmov 2131351028  }
  0x1e   : > { %2142 = vmatprep.mubr.msk.f32.mxu0 %vm2470_vm1, %v2469_v1  ;;  %2163 = vmatprep.mubr.msk.f32.mxu1 %vm2470_vm1, %v2469_v1 }
  0x21   : > { %2143 = vmatmul.mubr.msk.f32.gmra.mxu0 %vm213_vm2, %v195_v8  ;;  %2164 = vmatmul.mubr.msk.f32.gmra.mxu1 %vm213_vm2, %v202_v9  ;;  %v2474_v8 = vmov 2102212464  }
  0x22   : > { %2145 = vmatprep.mubr.msk.f32.mxu0 %vm2470_vm1, %v2469_v1  ;;  %2166 = vmatprep.mubr.msk.f32.mxu1 %vm2470_vm1, %v2469_v1 }
  0x25   : > { %2146 = vmatmul.mubr.msk.f32.gmra.mxu0 %vm213_vm2, %v196_v10  ;;  %2167 = vmatmul.mubr.msk.f32.gmra.mxu1 %vm213_vm2, %v203_v11  ;;  %v2475_v10 = vmov 920167782  }
  0x26   : > { %2148 = vmatprep.mubr.msk.f32.mxu0 %vm2470_vm1, %v2469_v1  ;;  %2169 = vmatprep.mubr.msk.f32.mxu1 %vm2470_vm1, %v2469_v1 }
  0x29   : > { %2149 = vmatmul.mubr.msk.f32.gmra.mxu0 %vm213_vm2, %v197_v12  ;;  %2170 = vmatmul.mubr.msk.f32.gmra.mxu1 %vm213_vm2, %v204_v13 }
  0x2a   : > { %2151 = vmatprep.mubr.msk.f32.mxu0 %vm2470_vm1, %v2469_v1 }
  0x2d   : > { %2152 = vmatmul.mubr.msk.f32.gmra.mxu0 %vm213_vm2, %v198_v14 }
  0xd5   : > { %v323_v16 = vpop.f32.mrf.mxu0  ;;  %v358_v17 = vpop.f32.mrf.mxu1 }
  0xd6   : > { %v324_v18 = vadd.f32 %v2581_v15, %v323_v16  ;;  %v359_v19 = vadd.f32 %v2581_v15, %v358_v17 }
  0xd7   : > { %v2135_v20 = vpop.f32.mrf.mxu0  ;;  %v2156_v21 = vpop.f32.mrf.mxu1 }
  0xd8   : > { %v2585_v22 = vmul.f32 30.0, %v324_v18  ;;  %v2587_v23 = vmul.f32 30.0, %v359_v19  ;;  %v2476_v18 = vmov 1326507024  }
  0xd9   : > { %v328_v24 = vpop.f32.mrf.mxu0  ;;  %v363_v25 = vpop.f32.mrf.mxu1 }
  0xda   : > { %v400_v26 = vand.u32 2147483647, %v2585_v22  ;;  %v403_v27 = vand.u32 2139095040, %v2585_v22  ;;  %v1128_v28 = vand.u32 2147483647, %v2587_v23  ;;  %v1131_v29 = vand.u32 2139095040, %v2587_v23 }
  0xdb   : > { %v2138_v30 = vpop.f32.mrf.mxu0  ;;  %v2159_v31 = vpop.f32.mrf.mxu1  ;;  %v329_v33 = vadd.f32 %v2581_v15, %v328_v24  ;;  %v2610_v58 = vadd.f32 %v2581_v15, %v363_v25  ;;  %vm402_vm0 = vcmp.lt.s32.totalorder %v2585_v22, 0  ;;  %vm1130_vm1 = vcmp.lt.s32.totalorder %v2587_v23, 0 }
  0xdc   : > { %v404_v32 = vshrl.u32 %v403_v27, 23  ;;  %v407_v34 = vand.u32 8388607, %v400_v26  ;;  %v1132_v35 = vshrl.u32 %v1131_v29, 23  ;;  %v1135_v36 = vand.u32 8388607, %v1128_v28 }
  0xdd   : > { %v2598_v37 = vpop.f32.mrf.mxu0  ;;  %v2600_v38 = vpop.f32.mrf.mxu1  ;;  %v2602_v40 = vmul.f32 30.0, %v329_v33 }
  0xde   : > { %v2052_v39 = vadd.s32 4294967169, %v404_v32  ;;  %v2080_v41 = vadd.s32 4294967169, %v1132_v35  ;;  %v408_v45 = vor.u32 8388608, %v407_v34  ;;  %v1136_v46 = vor.u32 8388608, %v1135_v36 }
  0xdf   : > { %v2141_v42 = vpop.f32.mrf.mxu0  ;;  %v2162_v43 = vpop.f32.mrf.mxu1  ;;  %v507_v48 = vand.u32 2139095040, %v2602_v40  ;;  %v504_v62 = vand.u32 2147483647, %v2602_v40 }
  0xe0   : > { %v410_v44 = vadd.s32 1, %v2052_v39  ;;  %v1138_v47 = vadd.s32 1, %v2080_v41  ;;  %v2612_v59 = vshll.u32 %v408_v45, 8  ;;  %v2616_v61 = vshll.u32 %v1136_v46, 8 }
  0xe1   : > { %v2605_v49 = vpop.f32.mrf.mxu0  ;;  %v2607_v50 = vpop.f32.mrf.mxu1  ;;  %v508_v52 = vshrl.u32 %v507_v48, 23 }
  0xe2   : > { %vm411_vm3 = vcmp.gt.s32.totalorder %v410_v44, 0  ;;  %vm1139_vm4 = vcmp.gt.s32.totalorder %v1138_v47, 0 }
  0xe3   : > { %v412_v51 = vsel %vm411_vm3, %v410_v44, 0  ;;  %v2144_v53 = vpop.f32.mrf.mxu0  ;;  %v2165_v54 = vpop.f32.mrf.mxu1  ;;  %v1140_v57 = vsel %vm1139_vm4, %v1138_v47, 0  ;;  %v2620_v3 = vadd.s32 4294967169, %v508_v52  ;;  %vm2721_vm4 = vcmp.le.f32.partialorder %v400_v26, 0.7853982 }
  0xe4   : > { %v413_v55 = vshrl.u32 %v412_v51, 5  ;;  %v414_v56 = vand.u32 31, %v412_v51  ;;  %v2614_v60 = vshrl.u32 %v1140_v57, 5  ;;  %v1142_v2 = vand.u32 31, %v1140_v57 }
  0xe6   : > { %v415_v63 = vsub.s32 32, %v414_v56  ;;  %v417_v1 = vshll.u32 %v2471_v0, %v414_v56  ;;  %v420_v5 = vshll.u32 %v2472_v4, %v414_v56  ;;  %v423_v7 = vshll.u32 %v2473_v6, %v414_v56 }
  0xe7   : > { %v426_v9 = vshll.u32 %v2474_v8, %v414_v56  ;;  %v429_v11 = vshll.u32 %v2475_v10, %v414_v56  ;;  %vm432_vm5 = vcmp.lt.s32.totalorder %v413_v55, 1  ;;  %vm434_vm6 = vcmp.lt.s32.totalorder %v413_v55, 3 }
  0xe8   : > { %v418_v12 = vshrl.u32 %v2472_v4, %v415_v63  ;;  %v421_v13 = vshrl.u32 %v2473_v6, %v415_v63  ;;  %v424_v14 = vshrl.u32 %v2474_v8, %v415_v63  ;;  %v416_v16 = vshrl.u32 %v2471_v0, %v415_v63 }
  0xe9   : > { %v427_v17 = vshrl.u32 %v2475_v10, %v415_v63  ;;  %v430_v19 = vshrl.u32 %v2476_v18, %v415_v63  ;;  %v1143_v25 = vsub.s32 32, %v1142_v2  ;;  %vm435_vm7 = vcmp.lt.s32.totalorder %v413_v55, 4 }
  0xea   : > { %v419_v20 = vor.u32 %v418_v12, %v417_v1  ;;  %v422_v21 = vor.u32 %v421_v13, %v420_v5  ;;  %v425_v24 = vor.u32 %v424_v14, %v423_v7  ;;  %v1145_v30 = vshll.u32 %v2471_v0, %v1142_v2 }
  0xeb   : > { %v428_v27 = vor.u32 %v427_v17, %v426_v9  ;;  %v431_v29 = vor.u32 %v430_v19, %v429_v11  ;;  %v1148_v41 = vshll.u32 %v2472_v4, %v1142_v2  ;;  %vm433_vm8 = vcmp.lt.s32.totalorder %v413_v55, 2 }
  0xec   : > { %v436_v31 = vsel %vm432_vm5, %v416_v16, %v419_v20  ;;  %v437_v32 = vsel %vm435_vm7, %v425_v24, 2102212464  ;;  %v440_v33 = vsel %vm432_vm5, %v419_v20, %v422_v21  ;;  %v444_v34 = vsel %vm432_vm5, %v422_v21, %v425_v24 }
  0xed   : > { %v438_v35 = vsel %vm434_vm6, %v422_v21, %v437_v32  ;;  %v441_v36 = vsel %vm435_vm7, %v428_v27, 920167782  ;;  %v445_v39 = vsel %vm435_vm7, %v431_v29, 1326507024  ;;  %v1146_v44 = vshrl.u32 %v2472_v4, %v1143_v25 }
  0xee   : > { %v442_v42 = vsel %vm434_vm6, %v425_v24, %v441_v36  ;;  %v446_v43 = vsel %vm434_vm6, %v428_v27, %v445_v39  ;;  %v439_v45 = vsel %vm433_vm8, %v436_v31, %v438_v35  ;;  %v1149_v48 = vshrl.u32 %v2473_v6, %v1143_v25 }
  0xef   : > { %v443_v46 = vsel %vm433_vm8, %v440_v33, %v442_v42  ;;  %v447_v47 = vsel %vm433_vm8, %v444_v34, %v446_v43  ;;  %v1147_v56 = vor.u32 %v1146_v44, %v1145_v30  ;;  %v1151_v55 = vshll.u32 %v2473_v6, %v1142_v2  ;;  %v2681_v44 = vpop.f32.mrf.mxu0 }
  0xf0   : > { %v2643_v51 = vmul.u32.u64.low %v2612_v59, %v447_v47  ;;  %v2644_v52 = vmul.u32.u64.high %v2612_v59, %v447_v47, %v2643_v51  ;;  %v2647_v53 = vmul.u32.u64.low %v2612_v59, %v443_v46  ;;  %v2648_v54 = vmul.u32.u64.high %v2612_v59, %v443_v46, %v2647_v53 }
  0xf1   : > { %v1150_v57 = vor.u32 %v1149_v48, %v1148_v41  ;;  %v1152_v63 = vshrl.u32 %v2474_v8, %v1143_v25  ;;  %v1154_v1 = vshll.u32 %v2474_v8, %v1142_v2  ;;  %v1155_v5 = vshrl.u32 %v2475_v10, %v1143_v25  ;;  %v2147_v48 = vpop.f32.mrf.mxu0 }
  0xf2   : > { %v1157_v7 = vshll.u32 %v2475_v10, %v1142_v2  ;;  %v1158_v9 = vshrl.u32 %v2476_v18, %v1143_v25  ;;  %v455_v11 = vmul.u32 %v2612_v59, %v439_v45  ;;  %v1144_v12 = vshrl.u32 %v2471_v0, %v1143_v25 }
  0xf3   : > { %v1153_v13 = vor.u32 %v1152_v63, %v1151_v55  ;;  %vm1160_vm9 = vcmp.lt.s32.totalorder %v2614_v60, 1  ;;  %vm457_vm10 = vc.u32 %v2644_v52, %v2647_v53  ;;  %v458_v14 = vadd.s32 1, %v2648_v54 }
  0xf4   : > { %v1156_v16 = vor.u32 %v1155_v5, %v1154_v1  ;;  %vm1161_vm11 = vcmp.lt.s32.totalorder %v2614_v60, 2  ;;  %v1159_v17 = vor.u32 %v1158_v9, %v1157_v7  ;;  %vm1162_vm12 = vcmp.lt.s32.totalorder %v2614_v60, 3 }
  0xf5   : > { %vm1163_vm13 = vcmp.lt.s32.totalorder %v2614_v60, 4  ;;  %v1168_v2 = vsel %vm1160_vm9, %v1147_v56, %v1150_v57  ;;  %v459_v59 = vsel %vm457_vm10, %v458_v14, %v2648_v54  ;;  %v1172_v21 = vsel %vm1160_vm9, %v1150_v57, %v1153_v13 }
  0xf6   : > { %v1165_v19 = vsel %vm1163_vm13, %v1153_v13, 2102212464  ;;  %v1169_v20 = vsel %vm1163_vm13, %v1156_v16, 920167782  ;;  %v460_v24 = vadd.s32 %v459_v59, %v455_v11  ;;  %v1164_v25 = vsel %vm1160_vm9, %v1144_v12, %v1147_v56 }
  0xf7   : > { %v1170_v27 = vsel %vm1162_vm12, %v1153_v13, %v1169_v20  ;;  %v1173_v29 = vsel %vm1163_vm13, %v1159_v17, 1326507024  ;;  %v1166_v30 = vsel %vm1162_vm12, %v1150_v57, %v1165_v19  ;;  %v514_v33 = vadd.s32 1, %v2620_v3 }
  0xf8   : > { %v1171_v31 = vsel %vm1161_vm11, %v1168_v2, %v1170_v27  ;;  %v1174_v32 = vsel %vm1162_vm12, %v1156_v16, %v1173_v29  ;;  %v461_v34 = vadd.s32 536870912, %v460_v24  ;;  %v511_v43 = vand.u32 8388607, %v504_v62 }
  0xf9   : > { %v1175_v35 = vsel %vm1161_vm11, %v1172_v21, %v1174_v32  ;;  %v2671_v36 = vmul.u32.u64.low %v2616_v61, %v1171_v31  ;;  %v2672_v39 = vmul.u32.u64.high %v2616_v61, %v1171_v31, %v2671_v36  ;;  %vm515_vm14 = vcmp.gt.s32.totalorder %v514_v33, 0 }
  0xfa   : > { %v2676_v41 = vmul.u32.u64.low %v2616_v61, %v1175_v35  ;;  %v2677_v42 = vmul.u32.u64.high %v2616_v61, %v1175_v35, %v2676_v41  ;;  %v462_v3 = vshrl.u32 %v461_v34, 30  ;;  %v1167_v45 = vsel %vm1161_vm11, %v1164_v25, %v1166_v30 }
  0xfb   : > { %v516_v46 = vsel %vm515_vm14, %v514_v33, 0  ;;  %v1186_v54 = vadd.s32 1, %v2672_v39  ;;  %v2687_v56 = vmul.f32 30.0, %v2610_v58  ;;  %v1183_v57 = vmul.u32 %v2616_v61, %v1167_v45 }
  0xfc   : > { %v518_v47 = vand.u32 31, %v516_v46  ;;  %v463_v51 = vshll.u32 %v462_v3, 30  ;;  %vm1185_vm15 = vc.u32 %v2677_v42, %v2671_v36  ;;  %v512_v55 = vor.u32 8388608, %v511_v43 }
  0xfd   : > { %v1187_v60 = vsel %vm1185_vm15, %v1186_v54, %v2672_v39  ;;  %v456_v7 = vadd.s32 %v2647_v53, %v2644_v52  ;;  %v1235_v61 = vand.u32 2139095040, %v2687_v56  ;;  %v2699_v14 = vshrl.u32 %v516_v46, 5 }
  0xfe   : > { %v519_v63 = vsub.s32 32, %v518_v47  ;;  %v464_v1 = vsub.s32 %v460_v24, %v463_v51  ;;  %v1188_v5 = vadd.s32 %v1187_v60, %v1183_v57  ;;  %v2696_v12 = vshll.u32 %v512_v55, 8 }
  0xff   : > { %v486_v2 = vsub.s32 4, %v462_v3  ;;  %v521_v19 = vshll.u32 %v2471_v0, %v518_v47  ;;  %v524_v20 = vshll.u32 %v2472_v4, %v518_v47  ;;  %v527_v21 = vshll.u32 %v2473_v6, %v518_v47 }
 0x100   : > { %v466_v9 = vsub.s32 0, %v464_v1  ;;  %v1189_v11 = vadd.s32 536870912, %v1188_v5  ;;  %v522_v58 = vshrl.u32 %v2472_v4, %v519_v63  ;;  %v525_v16 = vshrl.u32 %v2473_v6, %v519_v63 }
 0x101   : > { %v528_v17 = vshrl.u32 %v2474_v8, %v519_v63  ;;  %v531_v52 = vshrl.u32 %v2475_v10, %v519_v63  ;;  %v534_v24 = vshrl.u32 %v2476_v18, %v519_v63  ;;  %v530_v29 = vshll.u32 %v2474_v8, %v518_v47 }
 0x102   : > { %v2053_v13 = vmin.u32 %v466_v9, %v464_v1  ;;  %v1190_v59 = vshrl.u32 %v1189_v11, 30  ;;  %v523_v27 = vor.u32 %v522_v58, %v521_v19  ;;  %v1236_v30 = vshrl.u32 %v1235_v61, 23 }
 0x103   : > { %v526_v32 = vor.u32 %v525_v16, %v524_v20  ;;  %v529_v33 = vor.u32 %v528_v17, %v527_v21  ;;  %v533_v34 = vshll.u32 %v2475_v10, %v518_v47  ;;  %v2712_v35 = vsel %vm402_vm0, %v486_v2, %v462_v3 }
 0x104   : > { %v468_v53 = vclz %v2053_v13  ;;  %v1191_v25 = vshll.u32 %v1190_v59, 30  ;;  %v520_v41 = vshrl.u32 %v2471_v0, %v519_v63  ;;  %v532_v43 = vor.u32 %v531_v52, %v530_v29 }
 0x105   : > { %v1214_v45 = vsub.s32 4, %v1190_v59  ;;  %v535_v46 = vor.u32 %v534_v24, %v533_v34  ;;  %vm536_vm3 = vcmp.lt.s32.totalorder %v2699_v14, 1  ;;  %vm538_vm5 = vcmp.lt.s32.totalorder %v2699_v14, 3 }
 0x106   : > { %v2054_v31 = vadd.s32 4294967294, %v468_v53  ;;  %v2715_v39 = vsub.s32 %v1188_v5, %v1191_v25  ;;  %vm539_vm6 = vcmp.lt.s32.totalorder %v2699_v14, 4  ;;  %vm2730_vm7 = vcmp.le.f32.partialorder %v1128_v28, 0.7853982 }
 0x107   : > { %v541_v55 = vsel %vm539_vm6, %v529_v33, 2102212464  ;;  %v544_v26 = vsel %vm536_vm3, %v523_v27, %v526_v32  ;;  %v545_v5 = vsel %vm539_vm6, %v532_v43, 920167782  ;;  %v548_v9 = vsel %vm536_vm3, %v526_v32, %v529_v33 }
 0x108   : > { %vm2055_vm2 = vcmp.lt.s32.totalorder %v2054_v31, 0  ;;  %v1194_v48 = vsub.s32 0, %v2715_v39  ;;  %v546_v61 = vsel %vm538_vm5, %v529_v33, %v545_v5  ;;  %v549_v28 = vsel %vm539_vm6, %v535_v46, 1326507024 }
 0x109   : > { %v471_v3 = vsel %vm2055_vm2, 0, %v2054_v31  ;;  %vm537_vm8 = vcmp.lt.s32.totalorder %v2699_v14, 2  ;;  %v540_v16 = vsel %vm536_vm3, %v520_v41, %v523_v27  ;;  %v1215_v25 = vsel %vm1130_vm1, %v1214_v45, %v1190_v59 }
 0x10a   : > { %v472_v51 = vsub.s32 32, %v471_v3  ;;  %v476_v54 = vsub.s32 4294967266, %v471_v3  ;;  %v473_v63 = vshll.u32 %v464_v1, %v471_v3  ;;  %v2081_v60 = vmin.u32 %v1194_v48, %v2715_v39 }
 0x10b   : > { %v542_v1 = vsel %vm538_vm5, %v526_v32, %v541_v55  ;;  %v547_v19 = vsel %vm537_vm8, %v544_v26, %v546_v61  ;;  %v1184_v31 = vadd.s32 %v2671_v36, %v2677_v42  ;;  %v2084_v32 = vadd.s32 4294967169, %v1236_v30  ;;  %v2770_v30 = vpop.f32.mrf.mxu1 }
 0x10c   : > { %v474_v11 = vshrl.u32 %v456_v7, %v472_v51  ;;  %v477_v58 = vadd.s32 127, %v476_v54  ;;  %v1196_v13 = vclz %v2081_v60  ;;  %v550_v7 = vsel %vm538_vm5, %v532_v43, %v549_v28 }
 0x10d   : > { %v551_v53 = vsel %vm537_vm8, %v548_v9, %v550_v7  ;;  %v2749_v20 = vmul.u32.u64.low %v2696_v12, %v547_v19  ;;  %v2750_v21 = vmul.u32.u64.high %v2696_v12, %v547_v19, %v2749_v20  ;;  %v543_v14 = vsel %vm537_vm8, %v540_v16, %v542_v1  ;;  %v2168_v5 = vpop.f32.mrf.mxu1 }
 0x10e   : > { %v475_v17 = vor.u32 %v474_v11, %v473_v63  ;;  %v478_v2 = vshll.u32 %v477_v58, 23  ;;  %v2082_v52 = vadd.s32 4294967294, %v1196_v13  ;;  %v489_v41 = vsel %vm2721_vm4, 0, %v2712_v35 }
 0x10f   : > { %v2756_v27 = vmul.u32.u64.low %v2696_v12, %v551_v53  ;;  %v2757_v29 = vmul.u32.u64.high %v2696_v12, %v551_v53, %v2756_v27  ;;  %v1217_v59 = vsel %vm2730_vm7, 0, %v1215_v25  ;;  %v562_v45 = vadd.s32 1, %v2750_v21 }
 0x110   : > { %v479_v24 = vor.u32 4788187, %v478_v2  ;;  %vm2083_vm9 = vcmp.lt.s32.totalorder %v2082_v52, 0  ;;  %v482_v34 = vcvt.s32.f32 %v475_v17  ;;  %v559_v36 = vmul.u32 %v2696_v12, %v543_v14 }
 0x111   : > { %v1199_v43 = vsel %vm2083_vm9, 0, %v2082_v52  ;;  %vm561_vm10 = vc.u32 %v2757_v29, %v2749_v20  ;;  %v1242_v42 = vadd.s32 1, %v2084_v32  ;;  %v1232_v60 = vand.u32 2147483647, %v2687_v56 }
 0x112   : > { %v480_v33 = vand.u32 2147483647, %v479_v24  ;;  %v1200_v46 = vsub.s32 32, %v1199_v43  ;;  %v1204_v3 = vsub.s32 4294967266, %v1199_v43  ;;  %v1201_v51 = vshll.u32 %v2715_v39, %v1199_v43 }
 0x113   : > { %v563_v55 = vsel %vm561_vm10, %v562_v45, %v2750_v21  ;;  %vm1243_vm11 = vcmp.gt.s32.totalorder %v1242_v42, 0  ;;  %v493_v9 = vadd.s32 3, %v489_v41  ;;  %v1221_v28 = vadd.s32 3, %v1217_v59 }
 0x114   : > { %v483_v48 = vmul.f32 %v482_v34, %v480_v33  ;;  %v1202_v35 = vshrl.u32 %v1184_v31, %v1200_v46  ;;  %v1205_v54 = vadd.s32 127, %v1204_v3  ;;  %v564_v63 = vadd.s32 %v563_v55, %v559_v36 }
 0x115   : > { %v1244_v58 = vsel %vm1243_vm11, %v1242_v42, 0  ;;  %v334_v17 = vadd.f32 %v2581_v15, %v2598_v37  ;;  %v2784_v2 = vadd.f32 %v2581_v15, %v2600_v38  ;;  %v1239_v7 = vand.u32 8388607, %v1232_v60 }
 0x116   : > { %v484_v26 = vxor.u32 2147483648, %v483_v48  ;;  %v1203_v12 = vor.u32 %v1202_v35, %v1201_v51  ;;  %v1206_v11 = vshll.u32 %v1205_v54, 23  ;;  %v565_v13 = vadd.s32 536870912, %v564_v63 }
 0x117   : > { %v1246_v39 = vand.u32 31, %v1244_v58  ;;  %v2790_v53 = vand.u32 3, %v493_v9  ;;  %v2792_v24 = vand.u32 3, %v1221_v28  ;;  %v2807_v3 = vadd.s32 %v2749_v20, %v2757_v29 }
 0x118   : > { %v485_v61 = vsel %vm402_vm0, %v484_v26, %v483_v48  ;;  %v1207_v1 = vor.u32 4788187, %v1206_v11  ;;  %v2786_v19 = vshrl.u32 %v565_v13, 30  ;;  %v1210_v21 = vcvt.s32.f32 %v1203_v12 }
 0x119   : > { %v488_v16 = vsel %vm2721_vm4, %v2585_v22, %v485_v61  ;;  %v1247_v52 = vsub.s32 32, %v1246_v39  ;;  %v1249_v25 = vshll.u32 %v2471_v0, %v1246_v39  ;;  %v1252_v38 = vshll.u32 %v2472_v4, %v1246_v39 }
 0x11a   : > { %2324 = vcosq.f32 %v488_v16  ;;  %v1208_v47 = vand.u32 2147483647, %v1207_v1  ;;  %v567_v37 = vshll.u32 %v2786_v19, 30  ;;  %v1255_v31 = vshll.u32 %v2473_v6, %v1246_v39 }
 0x11b   : > { %2326 = vsinq.f32 %v488_v16  ;;  %v1256_v14 = vshrl.u32 %v2474_v8, %v1247_v52  ;;  %v1258_v32 = vshll.u32 %v2474_v8, %v1246_v39  ;;  %v1250_v34 = vshrl.u32 %v2472_v4, %v1247_v52 }
 0x11c   : > { %v1211_v27 = vmul.f32 %v1210_v21, %v1208_v47  ;;  %v2800_v33 = vsub.s32 %v564_v63, %v567_v37  ;;  %v1253_v41 = vshrl.u32 %v2473_v6, %v1247_v52  ;;  %v1259_v43 = vshrl.u32 %v2475_v10, %v1247_v52 }
 0x11d   : > { %v1240_v59 = vor.u32 8388608, %v1239_v7  ;;  %v2809_v45 = vmul.f32 30.0, %v334_v17  ;;  %v2812_v36 = vshrl.u32 %v1244_v58, 5  ;;  %v1248_v42 = vshrl.u32 %v2471_v0, %v1247_v52 }
 0x11e   : > { %v1212_v46 = vxor.u32 2147483648, %v1211_v27  ;;  %v570_v48 = vsub.s32 0, %v2800_v33  ;;  %v1261_v51 = vshll.u32 %v2475_v10, %v1246_v39  ;;  %vm499_vm12 = vcmp.eq.s32.totalorder %v2790_v53, 2 }
 0x11f   : > { %v1257_v54 = vor.u32 %v1256_v14, %v1255_v31  ;;  %v1260_v20 = vor.u32 %v1259_v43, %v1258_v32  ;;  %v1262_v29 = vshrl.u32 %v2476_v18, %v1247_v52  ;;  %vm496_vm13 = vcmp.eq.s32.totalorder %v2790_v53, 0 }
 0x120   : > { %v1213_v35 = vsel %vm1130_vm1, %v1212_v46, %v1211_v27  ;;  %v2057_v26 = vmin.u32 %v570_v48, %v2800_v33  ;;  %v1251_v63 = vor.u32 %v1250_v34, %v1249_v25  ;;  %v1254_v5 = vor.u32 %v1253_v41, %v1252_v38 }
 0x121   : > { %v1216_v55 = vsel %vm2730_vm7, %v2587_v23, %v1213_v35  ;;  %vm495_vm14 = vcmp.lt.s32.totalorder %v2790_v53, 2  ;;  %vm1752_vm15 = vcmask 392192   ;;  %v1263_v9 = vor.u32 %v1262_v29, %v1261_v51 }
 0x122   : > { %2328 = vcosq.f32 %v1216_v55  ;;  %v2826_v12 = vshll.u32 %v1240_v59, 8  ;;  %v608_v11 = vand.u32 2147483647, %v2809_v45  ;;  %vm492_vm0 = vweird.f32 %v2585_v22  ;;  %v2846_v59 = vpop.f32.mrf.mxu0 }
 0x123   : > { %2330 = vsinq.f32 %v1216_v55  ;;  %v572_v58 = vclz %v2057_v26  ;;  %v590_v57 = vsub.s32 4, %v2786_v19  ;;  %vm1267_vm1 = vcmp.lt.s32.totalorder %v2812_v36, 4 }
 0x124   : > { %vm1264_vm2 = vcmp.lt.s32.totalorder %v2812_v36, 1  ;;  %vm1265_vm3 = vcmp.lt.s32.totalorder %v2812_v36, 2  ;;  %v1269_v61 = vsel %vm1267_vm1, %v1257_v54, 2102212464  ;;  %v1273_v28 = vsel %vm1267_vm1, %v1260_v20, 920167782  ;;  %v2150_v26 = vpop.f32.mrf.mxu0 }
 0x125   : > { %vm506_vm4 = vcmp.lt.s32.totalorder %v2602_v40, 0  ;;  %v2058_v13 = vadd.s32 4294967294, %v572_v58  ;;  %vm1266_vm5 = vcmp.lt.s32.totalorder %v2812_v36, 3  ;;  %v1268_v39 = vsel %vm1264_vm2, %v1248_v42, %v1251_v63 }
 0x126   : > { %v1276_v16 = vsel %vm1264_vm2, %v1254_v5, %v1257_v54  ;;  %v1272_v17 = vsel %vm1264_vm2, %v1251_v63, %v1254_v5  ;;  %v1274_v7 = vsel %vm1266_vm5, %v1257_v54, %v1273_v28  ;;  %v1277_v52 = vsel %vm1267_vm1, %v1263_v9, 1326507024 }
 0x127   : > { %v2325_v1 = vpop.eup %2324  ;;  %v611_v47 = vand.u32 2139095040, %v2809_v45  ;;  %vm2059_vm6 = vcmp.lt.s32.totalorder %v2058_v13, 0  ;;  %v1270_v25 = vsel %vm1266_vm5, %v1254_v5, %v1269_v61  ;;  %v1278_v38 = vsel %vm1266_vm5, %v1260_v20, %v1277_v52 }
 0x128   : > { %v2327_v21 = vpop.eup %2326  ;;  %v500_v37 = vxor.u32 2147483648, %v2325_v1  ;;  %v575_v31 = vsel %vm2059_vm6, 0, %v2058_v13  ;;  %v1279_v14 = vsel %vm1265_vm3, %v1276_v16, %v1278_v38  ;;  %v1275_v46 = vsel %vm1265_vm3, %v1272_v17, %v1274_v7 }
 0x129   : > { %v497_v27 = vxor.u32 2147483648, %v2327_v21  ;;  %v612_v32 = vshrl.u32 %v611_v47, 23  ;;  %v576_v41 = vsub.s32 32, %v575_v31  ;;  %v580_v43 = vsub.s32 4294967266, %v575_v31 }
 0x12a   : > { %v501_v34 = vsel %vm499_vm12, %v500_v37, %v2327_v21  ;;  %v2851_v42 = vmul.u32.u64.low %v2826_v12, %v1279_v14  ;;  %v2852_v51 = vmul.u32.u64.high %v2826_v12, %v1279_v14, %v2851_v42  ;;  %v577_v20 = vshll.u32 %v2800_v33, %v575_v31 }
 0x12b   : > { %v498_v48 = vsel %vm496_vm13, %v2325_v1, %v497_v27  ;;  %v2060_v35 = vadd.s32 4294967169, %v612_v32  ;;  %v578_v29 = vshrl.u32 %v2807_v3, %v576_v41  ;;  %v581_v55 = vadd.s32 127, %v580_v43 }
 0x12c   : > { %v502_v54 = vsel %vm495_vm14, %v498_v48, %v501_v34  ;;  %vm1220_vm7 = vweird.f32 %v2587_v23  ;;  %v2862_v5 = vmul.u32.u64.low %v2826_v12, %v1275_v46  ;;  %v2863_v9 = vmul.u32.u64.high %v2826_v12, %v1275_v46, %v2862_v5 }
 0x12d   : > { %v503_v63 = vsel %vm492_vm0, nan, %v502_v54  ;;  %v618_v58 = vadd.s32 1, %v2060_v35  ;;  %vm1223_vm8 = vcmp.lt.s32.totalorder %v2792_v24, 2  ;;  %vm2874_vm9 = vcmp.le.f32.partialorder %v504_v62, 0.7853982 }
 0x12e   : > { %1753 = vst.msk [vmem:[%s2867_s6] sm:$0xff] %vm1752_vm15, %v503_v63  ;;  %v579_v53 = vor.u32 %v578_v29, %v577_v20  ;;  %v582_v33 = vshll.u32 %v581_v55, 23  ;;  %vm1224_vm10 = vcmp.eq.s32.totalorder %v2792_v24, 0  ;;  %v591_v3 = vsel %vm506_vm4, %v590_v57, %v2786_v19 }
 0x12f   : > { %v1271_v61 = vsel %vm1265_vm3, %v1268_v39, %v1270_v25  ;;  %vm619_vm11 = vcmp.gt.s32.totalorder %v618_v58, 0  ;;  %v2329_v28 = vpop.eup %2328  ;;  %vm1289_vm12 = vc.u32 %v2852_v51, %v2862_v5  ;;  %v615_v62 = vand.u32 8388607, %v608_v11 }
 0x130   : > { %v583_v13 = vor.u32 4788187, %v582_v33  ;;  %v620_v16 = vsel %vm619_vm11, %v618_v58, 0  ;;  %v2331_v1 = vpop.eup %2330  ;;  %vm1227_vm13 = vcmp.eq.s32.totalorder %v2792_v24, 2  ;;  %v1228_v17 = vxor.u32 2147483648, %v2329_v28 }
 0x131   : > { %v1290_v7 = vadd.s32 1, %v2863_v9  ;;  %v622_v19 = vand.u32 31, %v620_v16  ;;  %v1225_v57 = vxor.u32 2147483648, %v2331_v1  ;;  %v586_v39 = vcvt.s32.f32 %v579_v53 }
 0x132   : > { %v584_v36 = vand.u32 2147483647, %v583_v13  ;;  %v1287_v52 = vmul.u32 %v2826_v12, %v1271_v61  ;;  %v1229_v47 = vsel %vm1227_vm13, %v1228_v17, %v2331_v1  ;;  %v593_v21 = vsel %vm2874_vm9, 0, %v591_v3 }
 0x133   : > { %v1291_v37 = vsel %vm1289_vm12, %v1290_v7, %v2863_v9  ;;  %v623_v25 = vsub.s32 32, %v622_v19  ;;  %v1226_v38 = vsel %vm1224_vm10, %v2329_v28, %v1225_v57  ;;  %v616_v14 = vor.u32 8388608, %v615_v62 }
 0x134   : > { %v587_v27 = vmul.f32 %v586_v39, %v584_v36  ;;  %v1292_v31 = vadd.s32 %v1291_v37, %v1287_v52  ;;  %v1230_v32 = vsel %vm1223_vm8, %v1226_v38, %v1229_v47  ;;  %v625_v34 = vshll.u32 %v2471_v0, %v622_v19 }
 0x135   : > { %v626_v12 = vshrl.u32 %v2472_v4, %v623_v25  ;;  %v629_v41 = vshrl.u32 %v2473_v6, %v623_v25  ;;  %v1231_v43 = vsel %vm1220_vm7, nan, %v1230_v32  ;;  %v621_v42 = vshrl.u32 %v620_v16, 5 }
 0x136   : > { %v588_v46 = vxor.u32 2147483648, %v587_v27  ;;  %v1293_v48 = vadd.s32 536870912, %v1292_v31  ;;  %1760 = vst.msk [vmem:[%s2867_s6 + $0x38] sm:$0xff] %vm1752_vm15, %v1231_v43  ;;  %v628_v54 = vshll.u32 %v2472_v4, %v622_v19  ;;  %v631_v24 = vshll.u32 %v2473_v6, %v622_v19 }
 0x137   : > { %v627_v35 = vor.u32 %v626_v12, %v625_v34  ;;  %v632_v20 = vshrl.u32 %v2474_v8, %v623_v25  ;;  %v634_v26 = vshll.u32 %v2474_v8, %v622_v19  ;;  %v635_v23 = vshrl.u32 %v2475_v10, %v623_v25 }
 0x138   : > { %v589_v29 = vsel %vm506_vm4, %v588_v46, %v587_v27  ;;  %v1294_v55 = vshrl.u32 %v1293_v48, 30  ;;  %v630_v9 = vor.u32 %v629_v41, %v628_v54  ;;  %v637_v58 = vshll.u32 %v2475_v10, %v622_v19  ;;  %v2938_v41 = vpop.f32.mrf.mxu1 }
 0x139   : > { %v592_v63 = vsel %vm2874_vm9, %v2602_v40, %v589_v29  ;;  %v638_v53 = vshrl.u32 %v2476_v18, %v623_v25  ;;  %v633_v3 = vor.u32 %v632_v20, %v631_v24  ;;  %v636_v61 = vor.u32 %v635_v23, %v634_v26 }
 0x13a   : > { %2332 = vcosq.f32 %v592_v63  ;;  %v1295_v33 = vshll.u32 %v1294_v55, 30  ;;  %v597_v13 = vadd.s32 3, %v593_v21  ;;  %vm640_vm14 = vcmp.lt.s32.totalorder %v621_v42, 1  ;;  %v2171_v24 = vpop.f32.mrf.mxu1 }
 0x13b   : > { %2334 = vsinq.f32 %v592_v63  ;;  %v639_v28 = vor.u32 %v638_v53, %v637_v58  ;;  %vm643_vm0 = vcmp.lt.s32.totalorder %v621_v42, 4  ;;  %vm642_vm1 = vcmp.lt.s32.totalorder %v621_v42, 3 }
 0x13c   : > { %v2917_v62 = vsub.s32 %v1292_v31, %v1295_v33  ;;  %v648_v22 = vsel %vm640_vm14, %v627_v35, %v630_v9  ;;  %v649_v16 = vsel %vm643_vm0, %v636_v61, 920167782  ;;  %v2921_v1 = vmul.f32 30.0, %v2784_v2 }
 0x13d   : > { %vm641_vm2 = vcmp.lt.s32.totalorder %v621_v42, 2  ;;  %v650_v7 = vsel %vm642_vm1, %v633_v3, %v649_v16  ;;  %v656_v19 = vshll.u32 %v616_v14, 8  ;;  %v645_v57 = vsel %vm643_vm0, %v633_v3, 2102212464 }
 0x13e   : > { %v1298_v17 = vsub.s32 0, %v2917_v62  ;;  %v651_v36 = vsel %vm641_vm2, %v648_v22, %v650_v7  ;;  %v652_v39 = vsel %vm640_vm14, %v630_v9, %v633_v3  ;;  %v653_v52 = vsel %vm643_vm0, %v639_v28, 1326507024 }
 0x13f   : > { %v598_v47 = vand.u32 3, %v597_v13  ;;  %v624_v37 = vshrl.u32 %v2471_v0, %v623_v25  ;;  %v654_v2 = vsel %vm642_vm1, %v636_v61, %v653_v52  ;;  %v1339_v14 = vand.u32 2139095040, %v2921_v1 }
 0x140   : > { %v2085_v21 = vmin.u32 %v1298_v17, %v2917_v62  ;;  %v655_v38 = vsel %vm641_vm2, %v652_v39, %v654_v2  ;;  %v2931_v27 = vmul.u32.u64.low %v656_v19, %v651_v36  ;;  %v2932_v31 = vmul.u32.u64.high %v656_v19, %v651_v36, %v2931_v27 }
 0x141   : > { %v644_v34 = vsel %vm640_vm14, %v624_v37, %v627_v35  ;;  %v646_v12 = vsel %vm642_vm1, %v630_v9, %v645_v57  ;;  %v1318_v43 = vsub.s32 4, %v1294_v55  ;;  %v1340_v48 = vshrl.u32 %v1339_v14, 23 }
 0x142   : > { %v1300_v32 = vclz %v2085_v21  ;;  %v2940_v46 = vmul.u32.u64.low %v656_v19, %v655_v38  ;;  %v2941_v25 = vmul.u32.u64.high %v656_v19, %v655_v38, %v2940_v46  ;;  %vm596_vm3 = vweird.f32 %v2602_v40 }
 0x143   : > { %vm599_vm4 = vcmp.lt.s32.totalorder %v598_v47, 2  ;;  %vm2946_vm5 = vcmp.le.f32.partialorder %v1232_v60, 0.7853982  ;;  %vm1234_vm6 = vcmp.lt.s32.totalorder %v2687_v56, 0  ;;  %vm600_vm7 = vcmp.eq.s32.totalorder %v598_v47, 0 }
 0x144   : > { %v2086_v35 = vadd.s32 4294967294, %v1300_v32  ;;  %v647_v20 = vsel %vm641_vm2, %v644_v34, %v646_v12  ;;  %v666_v29 = vadd.s32 1, %v2932_v31  ;;  %v2088_v26 = vadd.s32 4294967169, %v1340_v48 }
 0x145   : > { %vm603_vm8 = vcmp.eq.s32.totalorder %v598_v47, 2  ;;  %v1288_v23 = vadd.s32 %v2862_v5, %v2852_v51  ;;  %v1336_v60 = vand.u32 2147483647, %v2921_v1  ;;  %v1319_v58 = vsel %vm1234_vm6, %v1318_v43, %v1294_v55 }
 0x146   : > { %vm2087_vm9 = vcmp.lt.s32.totalorder %v2086_v35, 0  ;;  %vm665_vm10 = vc.u32 %v2941_v25, %v2931_v27  ;;  %v1346_v42 = vadd.s32 1, %v2088_v26  ;;  %v663_v28 = vmul.u32 %v656_v19, %v647_v20 }
 0x147   : > { %v2333_v63 = vpop.eup %2332  ;;  %v1303_v9 = vsel %vm2087_vm9, 0, %v2086_v35  ;;  %v667_v5 = vsel %vm665_vm10, %v666_v29, %v2932_v31  ;;  %v1321_v57 = vsel %vm2946_vm5, 0, %v1319_v58  ;;  %v1343_v19 = vand.u32 8388607, %v1336_v60 }
 0x148   : > { %v2335_v53 = vpop.eup %2334  ;;  %v604_v33 = vxor.u32 2147483648, %v2333_v63  ;;  %v1304_v3 = vsub.s32 32, %v1303_v9  ;;  %v1308_v61 = vsub.s32 4294967266, %v1303_v9  ;;  %v1305_v51 = vshll.u32 %v2917_v62, %v1303_v9 }
 0x149   : > { %v601_v13 = vxor.u32 2147483648, %v2335_v53  ;;  %vm1347_vm11 = vcmp.gt.s32.totalorder %v1346_v42, 0  ;;  %v668_v17 = vadd.s32 %v667_v5, %v663_v28  ;;  %v1325_v31 = vadd.s32 3, %v1321_v57 }
 0x14a   : > { %v605_v22 = vsel %vm603_vm8, %v604_v33, %v2335_v53  ;;  %v1306_v16 = vshrl.u32 %v1288_v23, %v1304_v3  ;;  %v1309_v55 = vadd.s32 127, %v1308_v61  ;;  %v1348_v36 = vsel %vm1347_vm11, %v1346_v42, 0 }
 0x14b   : > { %v602_v7 = vsel %vm600_vm7, %v2333_v63, %v601_v13  ;;  %v669_v21 = vadd.s32 536870912, %v668_v17  ;;  %v1350_v2 = vand.u32 31, %v1348_v36  ;;  %v1344_v34 = vor.u32 8388608, %v1343_v19 }
 0x14c   : > { %v606_v62 = vsel %vm599_vm4, %v602_v7, %v605_v22  ;;  %v1307_v39 = vor.u32 %v1306_v16, %v1305_v51  ;;  %v1310_v52 = vshll.u32 %v1309_v55, 23  ;;  %v339_v47 = vadd.f32 %v2581_v15, %v2605_v49 }
 0x14d   : > { %v607_v37 = vsel %vm596_vm3, nan, %v606_v62  ;;  %v2973_v14 = vshrl.u32 %v669_v21, 30  ;;  %v1351_v12 = vsub.s32 32, %v1350_v2  ;;  %v1353_v48 = vshll.u32 %v2471_v0, %v1350_v2 }
 0x14e   : > { %1754 = vst.msk [vmem:[%s2867_s6 + $0x8] sm:$0xff] %vm1752_vm15, %v607_v37  ;;  %v1311_v38 = vor.u32 4788187, %v1310_v52  ;;  %v1314_v32 = vcvt.s32.f32 %v1307_v39  ;;  %v1356_v40 = vshll.u32 %v2472_v4, %v1350_v2  ;;  %v1359_v20 = vshll.u32 %v2473_v6, %v1350_v2 }
 0x14f   : > { %v671_v46 = vshll.u32 %v2973_v14, 30  ;;  %v1354_v35 = vshrl.u32 %v2472_v4, %v1351_v12  ;;  %v1357_v24 = vshrl.u32 %v2473_v6, %v1351_v12  ;;  %v1360_v29 = vshrl.u32 %v2474_v8, %v1351_v12 }
 0x150   : > { %v1312_v43 = vand.u32 2147483647, %v1311_v38  ;;  %v1362_v15 = vshll.u32 %v2474_v8, %v1350_v2  ;;  %v1363_v49 = vshrl.u32 %v2475_v10, %v1351_v12  ;;  %v2988_v63 = vand.u32 3, %v1325_v31 }
 0x151   : > { %v2984_v23 = vsub.s32 %v668_v17, %v671_v46  ;;  %v664_v9 = vadd.s32 %v2931_v27, %v2941_v25  ;;  %v2992_v58 = vmul.f32 30.0, %v339_v47  ;;  %v1349_v33 = vshrl.u32 %v1348_v36, 5 }
 0x152   : > { %v1315_v26 = vmul.f32 %v1314_v32, %v1312_v43  ;;  %v1355_v3 = vor.u32 %v1354_v35, %v1353_v48  ;;  %v1358_v61 = vor.u32 %v1357_v24, %v1356_v40  ;;  %v1361_v28 = vor.u32 %v1360_v29, %v1359_v20 }
 0x153   : > { %v674_v53 = vsub.s32 0, %v2984_v23  ;;  %v1365_v13 = vshll.u32 %v2475_v10, %v1350_v2  ;;  %v1366_v51 = vshrl.u32 %v2476_v18, %v1351_v12  ;;  %v1364_v16 = vor.u32 %v1363_v49, %v1362_v15  ;;  %v3021_v15 = vpop.f32.mrf.mxu0 }
 0x154   : > { %v1316_v42 = vxor.u32 2147483648, %v1315_v26  ;;  %v3000_v27 = vshll.u32 %v1344_v34, 8  ;;  %v1352_v55 = vshrl.u32 %v2471_v0, %v1351_v12  ;;  %v715_v7 = vand.u32 2139095040, %v2992_v58 }
 0x155   : > { %v2061_v22 = vmin.u32 %v674_v53, %v2984_v23  ;;  %v1367_v17 = vor.u32 %v1366_v51, %v1365_v13  ;;  %vm1368_vm12 = vcmp.lt.s32.totalorder %v1349_v33, 1  ;;  %vm1371_vm13 = vcmp.lt.s32.totalorder %v1349_v33, 4 }
 0x156   : > { %v1317_v5 = vsel %vm1234_vm6, %v1316_v42, %v1315_v26  ;;  %vm1369_vm14 = vcmp.lt.s32.totalorder %v1349_v33, 2  ;;  %v1373_v19 = vsel %vm1371_vm13, %v1361_v28, 2102212464  ;;  %v1376_v36 = vsel %vm1368_vm12, %v1355_v3, %v1358_v61 }
 0x157   : > { %v1320_v25 = vsel %vm2946_vm5, %v2687_v56, %v1317_v5  ;;  %v676_v57 = vclz %v2061_v22  ;;  %vm1370_vm0 = vcmp.lt.s32.totalorder %v1349_v33, 3  ;;  %v1377_v39 = vsel %vm1371_vm13, %v1364_v16, 920167782 }
 0x158   : > { %2336 = vcosq.f32 %v1320_v25  ;;  %v1380_v52 = vsel %vm1368_vm12, %v1358_v61, %v1361_v28  ;;  %v1372_v21 = vsel %vm1368_vm12, %v1352_v55, %v1355_v3  ;;  %v1378_v54 = vsel %vm1370_vm0, %v1361_v28, %v1377_v39  ;;  %v2153_v28 = vpop.f32.mrf.mxu0 }
 0x159   : > { %2338 = vsinq.f32 %v1320_v25  ;;  %v2062_v62 = vadd.s32 4294967294, %v676_v57  ;;  %v1381_v37 = vsel %vm1371_vm13, %v1367_v17, 1326507024  ;;  %v716_v2 = vshrl.u32 %v715_v7, 23 }
 0x15a   : > { %v1374_v38 = vsel %vm1370_vm0, %v1358_v61, %v1373_v19  ;;  %v1379_v31 = vsel %vm1369_vm14, %v1376_v36, %v1378_v54  ;;  %v1382_v32 = vsel %vm1370_vm0, %v1364_v16, %v1381_v37  ;;  %v712_v40 = vand.u32 2147483647, %v2992_v58 }
 0x15b   : > { %vm2063_vm1 = vcmp.lt.s32.totalorder %v2062_v62, 0  ;;  %v1383_v12 = vsel %vm1369_vm14, %v1380_v52, %v1382_v32  ;;  %v3010_v47 = vmul.u32.u64.low %v3000_v27, %v1379_v31  ;;  %v3011_v43 = vmul.u32.u64.high %v3000_v27, %v1379_v31, %v3010_v47 }
 0x15c   : > { %v679_v34 = vsel %vm2063_vm1, 0, %v2062_v62  ;;  %v2064_v35 = vadd.s32 4294967169, %v716_v2  ;;  %v694_v24 = vsub.s32 4, %v2973_v14  ;;  %v1375_v20 = vsel %vm1369_vm14, %v1372_v21, %v1374_v38 }
 0x15d   : > { %v680_v46 = vsub.s32 32, %v679_v34  ;;  %v684_v48 = vsub.s32 4294967266, %v679_v34  ;;  %v3018_v29 = vmul.u32.u64.low %v3000_v27, %v1383_v12  ;;  %v3019_v26 = vmul.u32.u64.high %v3000_v27, %v1383_v12, %v3018_v29 }
 0x15e   : > { %v681_v49 = vshll.u32 %v2984_v23, %v679_v34  ;;  %v722_v3 = vadd.s32 1, %v2064_v35  ;;  %vm3026_vm2 = vcmp.le.f32.partialorder %v608_v11, 0.7853982  ;;  %vm610_vm3 = vcmp.lt.s32.totalorder %v2809_v45, 0  ;;  %v3036_v23 = vld [vmem:[%s3641_s2] ss:$0 sm:$0xff] }
 0x15f   : > { %v682_v42 = vshrl.u32 %v664_v9, %v680_v46  ;;  %v685_v53 = vadd.s32 127, %v684_v48  ;;  %v1394_v33 = vadd.s32 1, %v3011_v43  ;;  %vm1324_vm4 = vweird.f32 %v2687_v56 }
 0x160   : > { %vm723_vm5 = vcmp.gt.s32.totalorder %v722_v3, 0  ;;  %v374_v11 = vadd.f32 %v3036_v23, %v2607_v50  ;;  %vm1327_vm6 = vcmp.lt.s32.totalorder %v2988_v63, 2  ;;  %v1391_v9 = vmul.u32 %v3000_v27, %v1375_v20 }
 0x161   : > { %v683_v13 = vor.u32 %v682_v42, %v681_v49  ;;  %v686_v51 = vshll.u32 %v685_v53, 23  ;;  %vm1393_vm7 = vc.u32 %v3019_v26, %v3010_v47  ;;  %v724_v5 = vsel %vm723_vm5, %v722_v3, 0 }
 0x162   : > { %v695_v16 = vsel %vm610_vm3, %v694_v24, %v2973_v14  ;;  %v1395_v25 = vsel %vm1393_vm7, %v1394_v33, %v3011_v43  ;;  %v719_v55 = vand.u32 8388607, %v712_v40  ;;  %vm1328_vm8 = vcmp.eq.s32.totalorder %v2988_v63, 0 }
 0x163   : > { %v687_v22 = vor.u32 4788187, %v686_v51  ;;  %vm1331_vm9 = vcmp.eq.s32.totalorder %v2988_v63, 2  ;;  %v1396_v50 = vadd.s32 %v1395_v25, %v1391_v9  ;;  %v726_v27 = vand.u32 31, %v724_v5 }
 0x164   : > { %v690_v36 = vcvt.s32.f32 %v683_v13  ;;  %v3052_v62 = vmul.f32 30.0, %v374_v11  ;;  %v697_v14 = vsel %vm3026_vm2, 0, %v695_v16  ;;  %v720_v2 = vor.u32 8388608, %v719_v55 }
 0x165   : > { %v2337_v17 = vpop.eup %2336  ;;  %v688_v19 = vand.u32 2147483647, %v687_v22  ;;  %v1397_v52 = vadd.s32 536870912, %v1396_v50  ;;  %v727_v21 = vsub.s32 32, %v726_v27  ;;  %v729_v38 = vshll.u32 %v2471_v0, %v726_v27 }
 0x166   : > { %v2339_v7 = vpop.eup %2338  ;;  %v1332_v57 = vxor.u32 2147483648, %v2337_v17  ;;  %v735_v12 = vshll.u32 %v2473_v6, %v726_v27  ;;  %v725_v29 = vshrl.u32 %v724_v5, 5  ;;  %v1443_v49 = vand.u32 2139095040, %v3052_v62 }
 0x167   : > { %v1329_v39 = vxor.u32 2147483648, %v2339_v7  ;;  %v691_v37 = vmul.f32 %v690_v36, %v688_v19  ;;  %v3059_v32 = vshrl.u32 %v1397_v52, 30  ;;  %v730_v34 = vshrl.u32 %v2472_v4, %v727_v21 }
 0x168   : > { %v1333_v54 = vsel %vm1331_vm9, %v1332_v57, %v2339_v7  ;;  %v733_v48 = vshrl.u32 %v2473_v6, %v727_v21  ;;  %v736_v35 = vshrl.u32 %v2474_v8, %v727_v21  ;;  %v732_v53 = vshll.u32 %v2472_v4, %v726_v27 }
 0x169   : > { %v1330_v31 = vsel %vm1328_vm8, %v2337_v17, %v1329_v39  ;;  %v692_v46 = vxor.u32 2147483648, %v691_v37  ;;  %v1399_v20 = vshll.u32 %v3059_v32, 30  ;;  %v731_v63 = vor.u32 %v730_v34, %v729_v38 }
 0x16a   : > { %v1334_v43 = vsel %vm1327_vm6, %v1330_v31, %v1333_v54  ;;  %v737_v3 = vor.u32 %v736_v35, %v735_v12  ;;  %v738_v28 = vshll.u32 %v2474_v8, %v726_v27  ;;  %v739_v13 = vshrl.u32 %v2475_v10, %v727_v21 }
 0x16b   : > { %v1335_v24 = vsel %vm1324_vm4, nan, %v1334_v43  ;;  %v693_v42 = vsel %vm610_vm3, %v692_v46, %v691_v37  ;;  %v3079_v56 = vsub.s32 %v1396_v50, %v1399_v20  ;;  %v734_v51 = vor.u32 %v733_v48, %v732_v53 }
 0x16c   : > { %1761 = vst.msk [vmem:[%s2867_s6 + $0x40] sm:$0xff] %vm1752_vm15, %v1335_v24  ;;  %v696_v33 = vsel %vm3026_vm2, %v2809_v45, %v693_v42  ;;  %v741_v11 = vshll.u32 %v2475_v10, %v726_v27  ;;  %v742_v9 = vshrl.u32 %v2476_v18, %v727_v21  ;;  %v701_v5 = vadd.s32 3, %v697_v14 }
 0x16d   : > { %2340 = vcosq.f32 %v696_v33  ;;  %v1402_v22 = vsub.s32 0, %v3079_v56  ;;  %v740_v16 = vor.u32 %v739_v13, %v738_v28  ;;  %vm747_vm10 = vcmp.lt.s32.totalorder %v725_v29, 4 }
 0x16e   : > { %2342 = vsinq.f32 %v696_v33  ;;  %v743_v25 = vor.u32 %v742_v9, %v741_v11  ;;  %v760_v61 = vshll.u32 %v720_v2, 8  ;;  %v1444_v55 = vshrl.u32 %v1443_v49, 23 }
 0x16f   : > { %v2089_v17 = vmin.u32 %v1402_v22, %v3079_v56  ;;  %v728_v50 = vshrl.u32 %v2471_v0, %v727_v21  ;;  %vm744_vm11 = vcmp.lt.s32.totalorder %v725_v29, 1  ;;  %v749_v7 = vsel %vm747_vm10, %v737_v3, 2102212464 }
 0x170   : > { %v752_v57 = vsel %vm744_vm11, %v731_v63, %v734_v51  ;;  %v753_v19 = vsel %vm747_vm10, %v740_v16, 920167782  ;;  %v756_v27 = vsel %vm744_vm11, %v734_v51, %v737_v3  ;;  %v757_v36 = vsel %vm747_vm10, %v743_v25, 1326507024 }
 0x171   : > { %v1404_v39 = vclz %v2089_v17  ;;  %vm745_vm12 = vcmp.lt.s32.totalorder %v725_v29, 2  ;;  %vm746_vm13 = vcmp.lt.s32.totalorder %v725_v29, 3  ;;  %v748_v14 = vsel %vm744_vm11, %v728_v50, %v731_v63 }
 0x172   : > { %v750_v52 = vsel %vm746_vm13, %v734_v51, %v749_v7  ;;  %v754_v54 = vsel %vm746_vm13, %v737_v3, %v753_v19  ;;  %v758_v37 = vsel %vm746_vm13, %v740_v16, %v757_v36  ;;  %v2092_v38 = vadd.s32 4294967169, %v1444_v55 }
 0x173   : > { %v2090_v2 = vadd.s32 4294967294, %v1404_v39  ;;  %v755_v31 = vsel %vm745_vm12, %v752_v57, %v754_v54  ;;  %v759_v34 = vsel %vm745_vm12, %v756_v27, %v758_v37  ;;  %vm1338_vm14 = vcmp.lt.s32.totalorder %v2921_v1, 0 }
 0x174   : > { %v3088_v12 = vmul.u32.u64.low %v760_v61, %v759_v34  ;;  %v3089_v43 = vmul.u32.u64.high %v760_v61, %v759_v34, %v3088_v12  ;;  %v3091_v21 = vmul.u32.u64.low %v760_v61, %v755_v31  ;;  %v3092_v46 = vmul.u32.u64.high %v760_v61, %v755_v31, %v3091_v21 }
 0x175   : > { %vm2091_vm0 = vcmp.lt.s32.totalorder %v2090_v2, 0  ;;  %v751_v48 = vsel %vm745_vm12, %v748_v14, %v750_v52  ;;  %v1450_v35 = vadd.s32 1, %v2092_v38  ;;  %vm700_vm1 = vweird.f32 %v2809_v45 }
 0x176   : > { %v702_v24 = vand.u32 3, %v701_v5  ;;  %v1392_v20 = vadd.s32 %v3010_v47, %v3019_v26  ;;  %v1407_v29 = vsel %vm2091_vm0, 0, %v2090_v2  ;;  %v1440_v49 = vand.u32 2147483647, %v3052_v62 }
 0x177   : > { %v1408_v42 = vsub.s32 32, %v1407_v29  ;;  %v1412_v63 = vsub.s32 4294967266, %v1407_v29  ;;  %v1422_v53 = vsub.s32 4, %v3059_v32  ;;  %vm1451_vm2 = vcmp.gt.s32.totalorder %v1450_v35, 0 }
 0x178   : > { %v767_v3 = vmul.u32 %v760_v61, %v751_v48  ;;  %vm769_vm3 = vc.u32 %v3089_v43, %v3091_v21  ;;  %v770_v33 = vadd.s32 1, %v3092_v46  ;;  %v1452_v28 = vsel %vm1451_vm2, %v1450_v35, 0 }
 0x179   : > { %vm3106_vm4 = vcmp.le.f32.partialorder %v1336_v60, 0.7853982  ;;  %v1409_v26 = vshll.u32 %v3079_v56, %v1407_v29  ;;  %v1410_v51 = vshrl.u32 %v1392_v20, %v1408_v42  ;;  %v1413_v11 = vadd.s32 127, %v1412_v63 }
 0x17a   : > { %v2341_v13 = vpop.eup %2340  ;;  %v1454_v9 = vand.u32 31, %v1452_v28  ;;  %vm703_vm5 = vcmp.lt.s32.totalorder %v702_v24, 2  ;;  %vm707_vm6 = vcmp.eq.s32.totalorder %v702_v24, 2  ;;  %v771_v16 = vsel %vm769_vm3, %v770_v33, %v3092_v46 }
 0x17b   : > { %v2343_v5 = vpop.eup %2342  ;;  %v708_v22 = vxor.u32 2147483648, %v2341_v13  ;;  %v1411_v61 = vor.u32 %v1410_v51, %v1409_v26  ;;  %v1414_v55 = vshll.u32 %v1413_v11, 23  ;;  %v772_v17 = vadd.s32 %v771_v16, %v767_v3 }
 0x17c   : > { %v705_v25 = vxor.u32 2147483648, %v2343_v5  ;;  %vm704_vm7 = vcmp.eq.s32.totalorder %v702_v24, 0  ;;  %v1447_v50 = vand.u32 8388607, %v1440_v49  ;;  %v1455_v56 = vsub.s32 32, %v1454_v9 }
 0x17d   : > { %v709_v60 = vsel %vm707_vm6, %v708_v22, %v2343_v5  ;;  %v1415_v57 = vor.u32 4788187, %v1414_v55  ;;  %v1423_v19 = vsel %vm1338_vm14, %v1422_v53, %v3059_v32  ;;  %v773_v27 = vadd.s32 536870912, %v772_v17 }
 0x17e   : > { %v706_v7 = vsel %vm704_vm7, %v2341_v13, %v705_v25  ;;  %v1418_v39 = vcvt.s32.f32 %v1411_v61  ;;  %v1457_v14 = vshll.u32 %v2471_v0, %v1454_v9  ;;  %v1460_v52 = vshll.u32 %v2472_v4, %v1454_v9 }
 0x17f   : > { %v710_v36 = vsel %vm703_vm5, %v706_v7, %v709_v60  ;;  %v1416_v37 = vand.u32 2147483647, %v1415_v57  ;;  %v3122_v38 = vshrl.u32 %v773_v27, 30  ;;  %v1463_v2 = vshll.u32 %v2473_v6, %v1454_v9 }
 0x180   : > { %v711_v54 = vsel %vm700_vm1, nan, %v710_v36  ;;  %v1458_v32 = vshrl.u32 %v2472_v4, %v1455_v56  ;;  %v1461_v31 = vshrl.u32 %v2473_v6, %v1455_v56  ;;  %v1464_v34 = vshrl.u32 %v2474_v8, %v1455_v56 }
 0x181   : > { %1755 = vst.msk [vmem:[%s2867_s6 + $0x10] sm:$0xff] %vm1752_vm15, %v711_v54  ;;  %v1466_v12 = vshll.u32 %v2474_v8, %v1454_v9  ;;  %v1419_v46 = vmul.f32 %v1418_v39, %v1416_v37  ;;  %v775_v48 = vshll.u32 %v3122_v38, 30  ;;  %v1467_v45 = vshrl.u32 %v2475_v10, %v1455_v56 }
 0x182   : > { %v344_v35 = vadd.f32 %v3036_v23, %v2681_v44  ;;  %v1425_v24 = vsel %vm3106_vm4, 0, %v1423_v19  ;;  %v1453_v20 = vshrl.u32 %v1452_v28, 5  ;;  %v1469_v29 = vshll.u32 %v2475_v10, %v1454_v9 }
 0x183   : > { %v1470_v42 = vshrl.u32 %v2476_v18, %v1455_v56  ;;  %v1420_v63 = vxor.u32 2147483648, %v1419_v46  ;;  %v3139_v53 = vsub.s32 %v772_v17, %v775_v48  ;;  %v1465_v3 = vor.u32 %v1464_v34, %v1463_v2 }
 0x184   : > { %v379_v33 = vadd.f32 %v3036_v23, %v2770_v30  ;;  %v1448_v13 = vor.u32 8388608, %v1447_v50  ;;  %v1459_v26 = vor.u32 %v1458_v32, %v1457_v14  ;;  %v1462_v51 = vor.u32 %v1461_v31, %v1460_v52 }
 0x185   : > { %v1468_v11 = vor.u32 %v1467_v45, %v1466_v12  ;;  %v1421_v44 = vsel %vm1338_vm14, %v1420_v63, %v1419_v46  ;;  %v1429_v5 = vadd.s32 3, %v1425_v24  ;;  %v778_v28 = vsub.s32 0, %v3139_v53 }
 0x186   : > { %v3146_v9 = vmul.f32 30.0, %v344_v35  ;;  %v1424_v22 = vsel %vm3106_vm4, %v2921_v1, %v1421_v44  ;;  %vm714_vm8 = vcmp.lt.s32.totalorder %v2992_v58, 0  ;;  %v1456_v30 = vshrl.u32 %v2471_v0, %v1455_v56 }
 0x187   : > { %v1471_v16 = vor.u32 %v1470_v42, %v1469_v29  ;;  %vm1475_vm9 = vcmp.lt.s32.totalorder %v1453_v20, 4  ;;  %2344 = vcosq.f32 %v1424_v22  ;;  %v2065_v25 = vmin.u32 %v778_v28, %v3139_v53 }
 0x188   : > { %vm1472_vm10 = vcmp.lt.s32.totalorder %v1453_v20, 1  ;;  %v1477_v61 = vsel %vm1475_vm9, %v1465_v3, 2102212464  ;;  %2346 = vsinq.f32 %v1424_v22  ;;  %v1481_v17 = vsel %vm1475_vm9, %v1468_v11, 920167782 }
 0x189   : > { %v1480_v55 = vsel %vm1472_vm10, %v1459_v26, %v1462_v51  ;;  %v1488_v60 = vshll.u32 %v1448_v13, 8  ;;  %vm3158_vm11 = vcmp.le.f32.partialorder %v712_v40, 0.7853982  ;;  %v780_v50 = vclz %v2065_v25 }
 0x18a   : > { %vm1473_vm12 = vcmp.lt.s32.totalorder %v1453_v20, 2  ;;  %vm1474_vm13 = vcmp.lt.s32.totalorder %v1453_v20, 3  ;;  %v1484_v56 = vsel %vm1472_vm10, %v1462_v51, %v1465_v3  ;;  %v1476_v7 = vsel %vm1472_vm10, %v1456_v30, %v1459_v26 }
 0x18b   : > { %v1478_v57 = vsel %vm1474_vm13, %v1462_v51, %v1477_v61  ;;  %v1482_v19 = vsel %vm1474_vm13, %v1465_v3, %v1481_v17  ;;  %v1485_v27 = vsel %vm1475_vm9, %v1471_v16, 1326507024  ;;  %v2066_v36 = vadd.s32 4294967294, %v780_v50 }
 0x18c   : > { %v798_v39 = vsub.s32 4, %v3122_v38  ;;  %v1483_v14 = vsel %vm1473_vm12, %v1480_v55, %v1482_v19  ;;  %v1486_v52 = vsel %vm1474_vm13, %v1468_v11, %v1485_v27  ;;  %v819_v2 = vand.u32 2139095040, %v3146_v9 }
 0x18d   : > { %v1487_v54 = vsel %vm1473_vm12, %v1484_v56, %v1486_v52  ;;  %v3164_v37 = vmul.u32.u64.low %v1488_v60, %v1483_v14  ;;  %v3165_v40 = vmul.u32.u64.high %v1488_v60, %v1483_v14, %v3164_v37  ;;  %vm2067_vm14 = vcmp.lt.s32.totalorder %v2066_v36, 0 }
 0x18e   : > { %v1479_v32 = vsel %vm1473_vm12, %v1476_v7, %v1478_v57  ;;  %v3169_v31 = vmul.u32.u64.low %v1488_v60, %v1487_v54  ;;  %v3170_v34 = vmul.u32.u64.high %v1488_v60, %v1487_v54, %v3169_v31  ;;  %v1430_v12 = vand.u32 3, %v1429_v5 }
 0x18f   : > { %v783_v46 = vsel %vm2067_vm14, 0, %v2066_v36  ;;  %v820_v48 = vshrl.u32 %v819_v2, 23  ;;  %v3172_v45 = vmul.f32 30.0, %v379_v33  ;;  %v768_v35 = vadd.s32 %v3091_v21, %v3089_v43 }
 0x190   : > { %v784_v24 = vsub.s32 32, %v783_v46  ;;  %v788_v20 = vsub.s32 4294967266, %v783_v46  ;;  %v799_v29 = vsel %vm714_vm8, %v798_v39, %v3122_v38  ;;  %v1495_v42 = vmul.u32 %v1488_v60, %v1479_v32 }
 0x191   : > { %v1498_v63 = vadd.s32 1, %v3165_v40  ;;  %v816_v3 = vand.u32 2147483647, %v3146_v9  ;;  %v2068_v13 = vadd.s32 4294967169, %v820_v48  ;;  %v785_v26 = vshll.u32 %v3139_v53, %v783_v46 }
 0x192   : > { %v786_v51 = vshrl.u32 %v768_v35, %v784_v24  ;;  %v789_v33 = vadd.s32 127, %v788_v20  ;;  %vm1497_vm0 = vc.u32 %v3170_v34, %v3164_v37  ;;  %v801_v43 = vsel %vm3158_vm11, 0, %v799_v29 }
 0x193   : > { %v1499_v21 = vsel %vm1497_vm0, %v1498_v63, %v3165_v40  ;;  %v826_v11 = vadd.s32 1, %v2068_v13  ;;  %v1547_v38 = vand.u32 2139095040, %v3172_v45  ;;  %vm1432_vm1 = vcmp.eq.s32.totalorder %v1430_v12, 0 }
 0x194   : > { %v787_v44 = vor.u32 %v786_v51, %v785_v26  ;;  %v790_v5 = vshll.u32 %v789_v33, 23  ;;  %v1500_v28 = vadd.s32 %v1499_v21, %v1495_v42  ;;  %v2345_v22 = vpop.eup %2344  ;;  %vm1435_vm2 = vcmp.eq.s32.totalorder %v1430_v12, 2 }
 0x195   : > { %vm827_vm3 = vcmp.gt.s32.totalorder %v826_v11, 0  ;;  %v2347_v53 = vpop.eup %2346  ;;  %v1436_v30 = vxor.u32 2147483648, %v2345_v22  ;;  %v805_v25 = vadd.s32 3, %v801_v43  ;;  %v823_v17 = vand.u32 8388607, %v816_v3 }
 0x196   : > { %v791_v16 = vor.u32 4788187, %v790_v5  ;;  %v1501_v61 = vadd.s32 536870912, %v1500_v28  ;;  %v1433_v55 = vxor.u32 2147483648, %v2347_v53  ;;  %v828_v60 = vsel %vm827_vm3, %v826_v11, 0 }
 0x197   : > { %v1548_v50 = vshrl.u32 %v1547_v38, 23  ;;  %v1437_v56 = vsel %vm1435_vm2, %v1436_v30, %v2347_v53  ;;  %v794_v57 = vcvt.s32.f32 %v787_v44  ;;  %vm1428_vm4 = vweird.f32 %v2921_v1 }
 0x198   : > { %v792_v7 = vand.u32 2147483647, %v791_v16  ;;  %v3190_v19 = vshrl.u32 %v1501_v61, 30  ;;  %vm1431_vm5 = vcmp.lt.s32.totalorder %v1430_v12, 2  ;;  %v1434_v27 = vsel %vm1432_vm1, %v2345_v22, %v1433_v55 }
 0x199   : > { %v830_v36 = vand.u32 31, %v828_v60  ;;  %v1438_v39 = vsel %vm1431_vm5, %v1434_v27, %v1437_v56  ;;  %v3197_v54 = vadd.f32 %v3036_v23, %v2846_v59  ;;  %v3199_v2 = vand.u32 3, %v805_v25 }
 0x19a   : > { %v795_v14 = vmul.f32 %v794_v57, %v792_v7  ;;  %v1503_v52 = vshll.u32 %v3190_v19, 30  ;;  %v1439_v40 = vsel %vm1428_vm4, nan, %v1438_v39  ;;  %v1544_v31 = vand.u32 2147483647, %v3172_v45 }
 0x19b   : > { %v831_v32 = vsub.s32 32, %v830_v36  ;;  %1762 = vst.msk [vmem:[%s2867_s6 + $0x48] sm:$0xff] %vm1752_vm15, %v1439_v40  ;;  %v824_v46 = vor.u32 8388608, %v823_v17  ;;  %v2096_v48 = vadd.s32 4294967169, %v1548_v50  ;;  %v833_v35 = vshll.u32 %v2471_v0, %v830_v36 }
 0x19c   : > { %v796_v1 = vxor.u32 2147483648, %v795_v14  ;;  %v3204_v12 = vsub.s32 %v1500_v28, %v1503_v52  ;;  %v836_v59 = vshll.u32 %v2472_v4, %v830_v36  ;;  %v839_v63 = vshll.u32 %v2473_v6, %v830_v36 }
 0x19d   : > { %v834_v24 = vshrl.u32 %v2472_v4, %v831_v32  ;;  %v837_v20 = vshrl.u32 %v2473_v6, %v831_v32  ;;  %v840_v13 = vshrl.u32 %v2474_v8, %v831_v32  ;;  %v829_v51 = vshrl.u32 %v828_v60, 5 }
 0x19e   : > { %v797_v29 = vsel %vm714_vm8, %v796_v1, %v795_v14  ;;  %v1506_v42 = vsub.s32 0, %v3204_v12  ;;  %v842_v38 = vshll.u32 %v2474_v8, %v830_v36  ;;  %v843_v44 = vshrl.u32 %v2475_v10, %v831_v32 }
 0x19f   : > { %v800_v26 = vsel %vm3158_vm11, %v2992_v58, %v797_v29  ;;  %v835_v33 = vor.u32 %v834_v24, %v833_v35  ;;  %v838_v43 = vor.u32 %v837_v20, %v836_v59  ;;  %v841_v11 = vor.u32 %v840_v13, %v839_v63 }
 0x1a0   : > { %2348 = vcosq.f32 %v800_v26  ;;  %v2093_v21 = vmin.u32 %v1506_v42, %v3204_v12  ;;  %v845_v5 = vshll.u32 %v2475_v10, %v830_v36  ;;  %v846_v28 = vshrl.u32 %v2476_v18, %v831_v32 }
 0x1a1   : > { %2350 = vsinq.f32 %v800_v26  ;;  %v1496_v47 = vadd.s32 %v3164_v37, %v3170_v34  ;;  %v3225_v53 = vshll.u32 %v824_v46, 8  ;;  %v1554_v30 = vadd.s32 1, %v2096_v48 }
 0x1a2   : > { %v1508_v22 = vclz %v2093_v21  ;;  %v1526_v16 = vsub.s32 4, %v3190_v19  ;;  %v832_v25 = vshrl.u32 %v2471_v0, %v831_v32  ;;  %v844_v61 = vor.u32 %v843_v44, %v842_v38 }
 0x1a3   : > { %v847_v55 = vor.u32 %v846_v28, %v845_v5  ;;  %vm1442_vm6 = vcmp.lt.s32.totalorder %v3052_v62, 0  ;;  %vm848_vm7 = vcmp.lt.s32.totalorder %v829_v51, 1  ;;  %vm850_vm8 = vcmp.lt.s32.totalorder %v829_v51, 3 }
 0x1a4   : > { %v2094_v17 = vadd.s32 4294967294, %v1508_v22  ;;  %vm851_vm9 = vcmp.lt.s32.totalorder %v829_v51, 4  ;;  %v856_v50 = vsel %vm848_vm7, %v835_v33, %v838_v43  ;;  %v860_v37 = vsel %vm848_vm7, %v838_v43, %v841_v11 }
 0x1a5   : > { %v853_v60 = vsel %vm851_vm9, %v841_v11, 2102212464  ;;  %v857_v56 = vsel %vm851_vm9, %v844_v61, 920167782  ;;  %vm849_vm11 = vcmp.lt.s32.totalorder %v829_v51, 2  ;;  %v852_v27 = vsel %vm848_vm7, %v832_v25, %v835_v33 }
 0x1a6   : > { %vm2095_vm10 = vcmp.lt.s32.totalorder %v2094_v17, 0  ;;  %v858_v34 = vsel %vm850_vm8, %v841_v11, %v857_v56  ;;  %v861_v7 = vsel %vm851_vm9, %v847_v55, 1326507024  ;;  %v854_v40 = vsel %vm850_vm8, %v838_v43, %v853_v60 }
 0x1a7   : > { %v1511_v57 = vsel %vm2095_vm10, 0, %v2094_v17  ;;  %v859_v36 = vsel %vm849_vm11, %v856_v50, %v858_v34  ;;  %v862_v39 = vsel %vm850_vm8, %v844_v61, %v861_v7  ;;  %vm807_vm12 = vcmp.lt.s32.totalorder %v3199_v2, 2 }
 0x1a8   : > { %v1512_v14 = vsub.s32 32, %v1511_v57  ;;  %v1516_v52 = vsub.s32 4294967266, %v1511_v57  ;;  %v863_v32 = vsel %vm849_vm11, %v860_v37, %v862_v39  ;;  %vm804_vm13 = vweird.f32 %v2992_v58 }
 0x1a9   : > { %v3237_v1 = vmul.u32.u64.low %v3225_v53, %v863_v32  ;;  %v3238_v46 = vmul.u32.u64.high %v3225_v53, %v863_v32, %v3237_v1  ;;  %v3241_v48 = vmul.u32.u64.low %v3225_v53, %v859_v36  ;;  %v3242_v35 = vmul.u32.u64.high %v3225_v53, %v859_v36, %v3241_v48 }
 0x1aa   : > { %vm3248_vm14 = vcmp.le.f32.partialorder %v1440_v49, 0.7853982  ;;  %v1513_v59 = vshll.u32 %v3204_v12, %v1511_v57  ;;  %v1514_v20 = vshrl.u32 %v1496_v47, %v1512_v14  ;;  %v1517_v29 = vadd.s32 127, %v1516_v52 }
 0x1ab   : > { %vm1555_vm0 = vcmp.gt.s32.totalorder %v1554_v30, 0  ;;  %vm808_vm1 = vcmp.eq.s32.totalorder %v3199_v2, 0  ;;  %vm811_vm2 = vcmp.eq.s32.totalorder %v3199_v2, 2  ;;  %v855_v42 = vsel %vm849_vm11, %v852_v27, %v854_v40 }
 0x1ac   : > { %v1556_v63 = vsel %vm1555_vm0, %v1554_v30, 0  ;;  %v1515_v13 = vor.u32 %v1514_v20, %v1513_v59  ;;  %v1518_v26 = vshll.u32 %v1517_v29, 23  ;;  %v1551_v49 = vand.u32 8388607, %v1544_v31 }
 0x1ad   : > { %v1558_v33 = vand.u32 31, %v1556_v63  ;;  %v2349_v43 = vpop.eup %2348  ;;  %v1527_v12 = vsel %vm1442_vm6, %v1526_v16, %v3190_v19  ;;  %vm873_vm3 = vc.u32 %v3238_v46, %v3241_v48  ;;  %v874_v21 = vadd.s32 1, %v3242_v35 }
 0x1ae   : > { %v3265_v51 = vmul.f32 30.0, %v3197_v54  ;;  %v2351_v11 = vpop.eup %2350  ;;  %v812_v38 = vxor.u32 2147483648, %v2349_v43  ;;  %v1519_v44 = vor.u32 4788187, %v1518_v26  ;;  %v871_v5 = vmul.u32 %v3225_v53, %v855_v42 }
 0x1af   : > { %v1559_v28 = vsub.s32 32, %v1558_v33  ;;  %v809_v47 = vxor.u32 2147483648, %v2351_v11  ;;  %v1522_v22 = vcvt.s32.f32 %v1515_v13  ;;  %v875_v30 = vsel %vm873_vm3, %v874_v21, %v3242_v35 }
 0x1b0   : > { %v1561_v19 = vshll.u32 %v2471_v0, %v1558_v33  ;;  %v813_v16 = vsel %vm811_vm2, %v812_v38, %v2351_v11  ;;  %v1520_v25 = vand.u32 2147483647, %v1519_v44  ;;  %v876_v61 = vadd.s32 %v875_v30, %v871_v5 }
 0x1b1   : > { %v1564_v54 = vshll.u32 %v2472_v4, %v1558_v33  ;;  %v810_v55 = vsel %vm808_vm1, %v2349_v43, %v809_v47  ;;  %v1562_v53 = vshrl.u32 %v2472_v4, %v1559_v28  ;;  %v1565_v17 = vshrl.u32 %v2473_v6, %v1559_v28 }
 0x1b2   : > { %v1567_v60 = vshll.u32 %v2473_v6, %v1558_v33  ;;  %v814_v50 = vsel %vm807_vm12, %v810_v55, %v813_v16  ;;  %v1523_v56 = vmul.f32 %v1522_v22, %v1520_v25  ;;  %v877_v37 = vadd.s32 536870912, %v876_v61 }
 0x1b3   : > { %v1568_v34 = vshrl.u32 %v2474_v8, %v1559_v28  ;;  %v815_v7 = vsel %vm804_vm13, nan, %v814_v50  ;;  %v1529_v57 = vsel %vm3248_vm14, 0, %v1527_v12  ;;  %v1552_v27 = vor.u32 8388608, %v1551_v49 }
 0x1b4   : > { %v1570_v36 = vshll.u32 %v2474_v8, %v1558_v33  ;;  %1756 = vst.msk [vmem:[%s2867_s6 + $0x18] sm:$0xff] %vm1752_vm15, %v815_v7  ;;  %v1524_v39 = vxor.u32 2147483648, %v1523_v56  ;;  %v3288_v14 = vshrl.u32 %v877_v37, 30  ;;  %v1557_v2 = vshrl.u32 %v1556_v63, 5 }
 0x1b5   : > { %v1571_v52 = vshrl.u32 %v2475_v10, %v1559_v28  ;;  %v1563_v40 = vor.u32 %v1562_v53, %v1561_v19  ;;  %v1566_v32 = vor.u32 %v1565_v17, %v1564_v54  ;;  %v1573_v1 = vshll.u32 %v2475_v10, %v1558_v33 }
 0x1b6   : > { %v1574_v58 = vshrl.u32 %v2476_v18, %v1559_v28  ;;  %v1525_v35 = vsel %vm1442_vm6, %v1524_v39, %v1523_v56  ;;  %v879_v59 = vshll.u32 %v3288_v14, 30  ;;  %v1569_v20 = vor.u32 %v1568_v34, %v1567_v60 }
 0x1b7   : > { %v1572_v29 = vor.u32 %v1571_v52, %v1570_v36  ;;  %v1528_v42 = vsel %vm3248_vm14, %v3052_v62, %v1525_v35  ;;  %v1533_v63 = vadd.s32 3, %v1529_v57  ;;  %v1592_v26 = vshll.u32 %v1552_v27, 8 }
 0x1b8   : > { %v1575_v13 = vor.u32 %v1574_v58, %v1573_v1  ;;  %2352 = vcosq.f32 %v1528_v42  ;;  %v3299_v49 = vsub.s32 %v876_v61, %v879_v59  ;;  %v1560_v33 = vshrl.u32 %v2471_v0, %v1559_v28 }
 0x1b9   : > { %vm1576_vm4 = vcmp.lt.s32.totalorder %v1557_v2, 1  ;;  %2354 = vsinq.f32 %v1528_v42  ;;  %vm1579_vm5 = vcmp.lt.s32.totalorder %v1557_v2, 4  ;;  %v923_v12 = vand.u32 2139095040, %v3265_v51 }
 0x1ba   : > { %v1584_v43 = vsel %vm1576_vm4, %v1563_v40, %v1566_v32  ;;  %v882_v21 = vsub.s32 0, %v3299_v49  ;;  %vm1578_vm6 = vcmp.lt.s32.totalorder %v1557_v2, 3  ;;  %v1581_v11 = vsel %vm1579_vm5, %v1569_v20, 2102212464 }
 0x1bb   : > { %v1585_v24 = vsel %vm1579_vm5, %v1572_v29, 920167782  ;;  %vm1577_vm7 = vcmp.lt.s32.totalorder %v1557_v2, 2  ;;  %v1588_v44 = vsel %vm1576_vm4, %v1566_v32, %v1569_v20  ;;  %v1589_v5 = vsel %vm1579_vm5, %v1575_v13, 1326507024 }
 0x1bc   : > { %v1586_v38 = vsel %vm1578_vm6, %v1569_v20, %v1585_v24  ;;  %v2069_v47 = vmin.u32 %v882_v21, %v3299_v49  ;;  %v1580_v22 = vsel %vm1576_vm4, %v1560_v33, %v1563_v40  ;;  %v1590_v30 = vsel %vm1578_vm6, %v1572_v29, %v1589_v5 }
 0x1bd   : > { %v1587_v28 = vsel %vm1577_vm7, %v1584_v43, %v1586_v38  ;;  %v1582_v19 = vsel %vm1578_vm6, %v1566_v32, %v1581_v11  ;;  %v1591_v16 = vsel %vm1577_vm7, %v1588_v44, %v1590_v30  ;;  %v1534_v54 = vand.u32 3, %v1533_v63 }
 0x1be   : > { %v3307_v25 = vmul.u32.u64.low %v1592_v26, %v1587_v28  ;;  %v3308_v61 = vmul.u32.u64.high %v1592_v26, %v1587_v28, %v3307_v25  ;;  %v884_v55 = vclz %v2069_v47  ;;  %v924_v60 = vshrl.u32 %v923_v12, 23 }
 0x1bf   : > { %v3311_v53 = vmul.u32.u64.low %v1592_v26, %v1591_v16  ;;  %v3312_v17 = vmul.u32.u64.high %v1592_v26, %v1591_v16, %v3311_v53  ;;  %vm3316_vm8 = vcmp.le.f32.partialorder %v816_v3, 0.7853982  ;;  %v1583_v37 = vsel %vm1577_vm7, %v1580_v22, %v1582_v19 }
 0x1c0   : > { %v2070_v56 = vadd.s32 4294967294, %v884_v55  ;;  %vm818_vm9 = vcmp.lt.s32.totalorder %v3146_v9, 0  ;;  %v902_v34 = vsub.s32 4, %v3288_v14  ;;  %v1602_v7 = vadd.s32 1, %v3308_v61 }
 0x1c1   : > { %v2072_v57 = vadd.s32 4294967169, %v924_v60  ;;  %vm1535_vm10 = vcmp.lt.s32.totalorder %v1534_v54, 2  ;;  %vm1536_vm11 = vcmp.eq.s32.totalorder %v1534_v54, 0  ;;  %v920_v27 = vand.u32 2147483647, %v3265_v51 }
 0x1c2   : > { %vm2071_vm12 = vcmp.lt.s32.totalorder %v2070_v56, 0  ;;  %v1599_v3 = vmul.u32 %v1592_v26, %v1583_v37  ;;  %vm1601_vm13 = vc.u32 %v3312_v17, %v3307_v25  ;;  %v872_v2 = vadd.s32 %v3241_v48, %v3238_v46 }
 0x1c3   : > { %v887_v36 = vsel %vm2071_vm12, 0, %v2070_v56  ;;  %v930_v39 = vadd.s32 1, %v2072_v57  ;;  %v1603_v32 = vsel %vm1601_vm13, %v1602_v7, %v3308_v61  ;;  %v903_v35 = vsel %vm818_vm9, %v902_v34, %v3288_v14 }
 0x1c4   : > { %v888_v52 = vsub.s32 32, %v887_v36  ;;  %v892_v40 = vsub.s32 4294967266, %v887_v36  ;;  %v889_v58 = vshll.u32 %v3299_v49, %v887_v36  ;;  %v1604_v59 = vadd.s32 %v1603_v32, %v1599_v3 }
 0x1c5   : > { %v2353_v1 = vpop.eup %2352  ;;  %vm931_vm14 = vcmp.gt.s32.totalorder %v930_v39, 0  ;;  %vm1539_vm0 = vcmp.eq.s32.totalorder %v1534_v54, 2  ;;  %v905_v49 = vsel %vm3316_vm8, 0, %v903_v35  ;;  %v927_v11 = vand.u32 8388607, %v920_v27 }
 0x1c6   : > { %v2355_v20 = vpop.eup %2354  ;;  %v1540_v29 = vxor.u32 2147483648, %v2353_v1  ;;  %v890_v42 = vshrl.u32 %v872_v2, %v888_v52  ;;  %v893_v63 = vadd.s32 127, %v892_v40  ;;  %v932_v13 = vsel %vm931_vm14, %v930_v39, 0 }
 0x1c7   : > { %v1537_v26 = vxor.u32 2147483648, %v2355_v20  ;;  %v1605_v46 = vadd.s32 536870912, %v1604_v59  ;;  %v934_v48 = vand.u32 31, %v932_v13  ;;  %vm1532_vm1 = vweird.f32 %v3052_v62 }
 0x1c8   : > { %v1541_v33 = vsel %vm1539_vm0, %v1540_v29, %v2355_v20  ;;  %v891_v43 = vor.u32 %v890_v42, %v889_v58  ;;  %v894_v12 = vshll.u32 %v893_v63, 23  ;;  %v3343_v47 = vadd.s32 3, %v905_v49 }
 0x1c9   : > { %v1538_v14 = vsel %vm1536_vm11, %v2353_v1, %v1537_v26  ;;  %v3337_v21 = vshrl.u32 %v1605_v46, 30  ;;  %v935_v24 = vsub.s32 32, %v934_v48  ;;  %v384_v19 = vadd.f32 %v3036_v23, %v2938_v41 }
 0x1ca   : > { %v1542_v38 = vsel %vm1535_vm10, %v1538_v14, %v1541_v33  ;;  %v895_v44 = vor.u32 4788187, %v894_v12  ;;  %v898_v30 = vcvt.s32.f32 %v891_v43  ;;  %v3352_v16 = vadd.f32 %v3036_v23, %v3021_v15 }
 0x1cb   : > { %v1543_v5 = vsel %vm1532_vm1, nan, %v1542_v38  ;;  %v1607_v22 = vshll.u32 %v3337_v21, 30  ;;  %v928_v61 = vor.u32 8388608, %v927_v11  ;;  %v938_v54 = vshrl.u32 %v2472_v4, %v935_v24 }
 0x1cc   : > { %1763 = vst.msk [vmem:[%s2867_s6 + $0x50] sm:$0xff] %vm1752_vm15, %v1543_v5  ;;  %v896_v28 = vand.u32 2147483647, %v895_v44  ;;  %v941_v55 = vshrl.u32 %v2473_v6, %v935_v24  ;;  %v933_v60 = vshrl.u32 %v932_v13, 5  ;;  %v937_v56 = vshll.u32 %v2471_v0, %v934_v48 }
 0x1cd   : > { %v3354_v62 = vsub.s32 %v1604_v59, %v1607_v22  ;;  %v944_v37 = vshrl.u32 %v2474_v8, %v935_v24  ;;  %v940_v41 = vshll.u32 %v2472_v4, %v934_v48  ;;  %v943_v15 = vshll.u32 %v2473_v6, %v934_v48 }
 0x1ce   : > { %v899_v53 = vmul.f32 %v898_v30, %v896_v28  ;;  %v947_v23 = vshrl.u32 %v2475_v10, %v935_v24  ;;  %v946_v57 = vshll.u32 %v2474_v8, %v934_v48  ;;  %v949_v36 = vshll.u32 %v2475_v10, %v934_v48 }
 0x1cf   : > { %v1610_v34 = vsub.s32 0, %v3354_v62  ;;  %v950_v3 = vshrl.u32 %v2476_v18, %v935_v24  ;;  %v939_v2 = vor.u32 %v938_v54, %v937_v56  ;;  %v942_v52 = vor.u32 %v941_v55, %v940_v41 }
 0x1d0   : > { %v900_v7 = vxor.u32 2147483648, %v899_v53  ;;  %v3368_v40 = vmul.f32 30.0, %v384_v19  ;;  %v945_v1 = vor.u32 %v944_v37, %v943_v15  ;;  %v948_v58 = vor.u32 %v947_v23, %v946_v57 }
 0x1d1   : > { %v2097_v39 = vmin.u32 %v1610_v34, %v3354_v62  ;;  %v951_v35 = vor.u32 %v950_v3, %v949_v36  ;;  %v1600_v20 = vadd.s32 %v3307_v25, %v3312_v17  ;;  %v968_v42 = vshll.u32 %v928_v61, 8 }
 0x1d2   : > { %v901_v32 = vsel %vm818_vm9, %v900_v7, %v899_v53  ;;  %v936_v63 = vshrl.u32 %v2471_v0, %v935_v24  ;;  %vm952_vm2 = vcmp.lt.s32.totalorder %v933_v60, 1  ;;  %vm954_vm3 = vcmp.lt.s32.totalorder %v933_v60, 3 }
 0x1d3   : > { %v904_v59 = vsel %vm3316_vm8, %v3146_v9, %v901_v32  ;;  %v1612_v29 = vclz %v2097_v39  ;;  %vm955_vm4 = vcmp.lt.s32.totalorder %v933_v60, 4  ;;  %v960_v26 = vsel %vm952_vm2, %v939_v2, %v942_v52 }
 0x1d4   : > { %2356 = vcosq.f32 %v904_v59  ;;  %v957_v46 = vsel %vm955_vm4, %v945_v1, 2102212464  ;;  %v961_v48 = vsel %vm955_vm4, %v948_v58, 920167782  ;;  %v964_v33 = vsel %vm952_vm2, %v942_v52, %v945_v1 }
 0x1d5   : > { %2358 = vsinq.f32 %v904_v59  ;;  %v2098_v13 = vadd.s32 4294967294, %v1612_v29  ;;  %v965_v43 = vsel %vm955_vm4, %v951_v35, 1326507024  ;;  %vm953_vm6 = vcmp.lt.s32.totalorder %v933_v60, 2 }
 0x1d6   : > { %v962_v50 = vsel %vm954_vm3, %v945_v1, %v961_v48  ;;  %v966_v25 = vsel %vm954_vm3, %v948_v58, %v965_v43  ;;  %v956_v12 = vsel %vm952_vm2, %v936_v63, %v939_v2  ;;  %v958_v38 = vsel %vm954_vm3, %v942_v52, %v957_v46 }
 0x1d7   : > { %vm2099_vm5 = vcmp.lt.s32.totalorder %v2098_v13, 0  ;;  %v963_v49 = vsel %vm953_vm6, %v960_v26, %v962_v50  ;;  %v967_v14 = vsel %vm953_vm6, %v964_v33, %v966_v25  ;;  %v1651_v44 = vand.u32 2139095040, %v3368_v40 }
 0x1d8   : > { %v1615_v17 = vsel %vm2099_vm5, 0, %v2098_v13  ;;  %v3384_v5 = vmul.u32.u64.low %v968_v42, %v967_v14  ;;  %v3385_v22 = vmul.u32.u64.high %v968_v42, %v967_v14, %v3384_v5  ;;  %v1630_v53 = vsub.s32 4, %v3337_v21 }
 0x1d9   : > { %v1616_v11 = vsub.s32 32, %v1615_v17  ;;  %v1620_v24 = vsub.s32 4294967266, %v1615_v17  ;;  %v3387_v28 = vmul.u32.u64.low %v968_v42, %v963_v49  ;;  %v3388_v30 = vmul.u32.u64.high %v968_v42, %v963_v49, %v3387_v28 }
 0x1da   : > { %v1617_v19 = vshll.u32 %v3354_v62, %v1615_v17  ;;  %v1652_v55 = vshrl.u32 %v1651_v44, 23  ;;  %v959_v56 = vsel %vm953_vm6, %v956_v12, %v958_v38  ;;  %vm908_vm7 = vweird.f32 %v3146_v9 }
 0x1db   : > { %v1618_v61 = vshrl.u32 %v1600_v20, %v1616_v11  ;;  %v1621_v54 = vadd.s32 127, %v1620_v24  ;;  %v910_v15 = vand.u32 3, %v3343_v47  ;;  %vm977_vm8 = vc.u32 %v3385_v22, %v3387_v28 }
 0x1dc   : > { %v2100_v41 = vadd.s32 4294967169, %v1652_v55  ;;  %v978_v23 = vadd.s32 1, %v3388_v30  ;;  %v3400_v62 = vmul.f32 30.0, %v3352_v16  ;;  %vm1546_vm9 = vcmp.lt.s32.totalorder %v3172_v45, 0 }
 0x1dd   : > { %v1619_v37 = vor.u32 %v1618_v61, %v1617_v19  ;;  %v1622_v34 = vshll.u32 %v1621_v54, 23  ;;  %v975_v60 = vmul.u32 %v968_v42, %v959_v56  ;;  %vm3405_vm10 = vcmp.le.f32.partialorder %v1544_v31, 0.7853982 }
 0x1de   : > { %v1658_v57 = vadd.s32 1, %v2100_v41  ;;  %v1631_v47 = vsel %vm1546_vm9, %v1630_v53, %v3337_v21  ;;  %v979_v3 = vsel %vm977_vm8, %v978_v23, %v3388_v30  ;;  %v1648_v16 = vand.u32 2147483647, %v3368_v40 }
 0x1df   : > { %v1623_v7 = vor.u32 4788187, %v1622_v34  ;;  %v1626_v52 = vcvt.s32.f32 %v1619_v37  ;;  %v980_v32 = vadd.s32 %v979_v3, %v975_v60  ;;  %vm915_vm12 = vcmp.eq.s32.totalorder %v910_v15, 2 }
 0x1e0   : > { %vm1659_vm11 = vcmp.gt.s32.totalorder %v1658_v57, 0  ;;  %v1027_v35 = vand.u32 2139095040, %v3400_v62  ;;  %v1633_v21 = vsel %vm3405_vm10, 0, %v1631_v47  ;;  %vm911_vm13 = vcmp.lt.s32.totalorder %v910_v15, 2 }
 0x1e1   : > { %v2357_v39 = vpop.eup %2356  ;;  %v1624_v2 = vand.u32 2147483647, %v1623_v7  ;;  %v1660_v31 = vsel %vm1659_vm11, %v1658_v57, 0  ;;  %v981_v29 = vadd.s32 536870912, %v980_v32  ;;  %vm912_vm14 = vcmp.eq.s32.totalorder %v910_v15, 0 }
 0x1e2   : > { %v2359_v1 = vpop.eup %2358  ;;  %v916_v58 = vxor.u32 2147483648, %v2357_v39  ;;  %v1662_v63 = vand.u32 31, %v1660_v31  ;;  %v1655_v48 = vand.u32 8388607, %v1648_v16  ;;  %v1637_v43 = vadd.s32 3, %v1633_v21 }
 0x1e3   : > { %v913_v59 = vxor.u32 2147483648, %v2359_v1  ;;  %v1627_v20 = vmul.f32 %v1626_v52, %v1624_v2  ;;  %v3417_v46 = vshrl.u32 %v981_v29, 30  ;;  %v1028_v25 = vshrl.u32 %v1027_v35, 23 }
 0x1e4   : > { %v917_v42 = vsel %vm915_vm12, %v916_v58, %v2359_v1  ;;  %v1663_v50 = vsub.s32 32, %v1662_v63  ;;  %v1665_v14 = vshll.u32 %v2471_v0, %v1662_v63  ;;  %v1668_v38 = vshll.u32 %v2472_v4, %v1662_v63 }
 0x1e5   : > { %v914_v13 = vsel %vm912_vm14, %v2357_v39, %v913_v59  ;;  %v1628_v26 = vxor.u32 2147483648, %v1627_v20  ;;  %v983_v49 = vshll.u32 %v3417_v46, 30  ;;  %v1656_v5 = vor.u32 8388608, %v1655_v48 }
 0x1e6   : > { %v918_v33 = vsel %vm911_vm13, %v914_v13, %v917_v42  ;;  %v1666_v24 = vshrl.u32 %v2472_v4, %v1663_v50  ;;  %v1669_v9 = vshrl.u32 %v2473_v6, %v1663_v50  ;;  %v1671_v30 = vshll.u32 %v2473_v6, %v1662_v63 }
 0x1e7   : > { %v919_v17 = vsel %vm908_vm7, nan, %v918_v33  ;;  %v1629_v12 = vsel %vm1546_vm9, %v1628_v26, %v1627_v20  ;;  %v3435_v44 = vsub.s32 %v980_v32, %v983_v49  ;;  %v3438_v19 = vand.u32 3, %v1637_v43 }
 0x1e8   : > { %1757 = vst.msk [vmem:[%s2867_s6 + $0x20] sm:$0xff] %vm1752_vm15, %v919_v17  ;;  %v1632_v11 = vsel %vm3405_vm10, %v3172_v45, %v1629_v12  ;;  %v1661_v61 = vshrl.u32 %v1660_v31, 5  ;;  %v2076_v54 = vadd.s32 4294967169, %v1028_v25  ;;  %v1667_v53 = vor.u32 %v1666_v24, %v1665_v14 }
 0x1e9   : > { %2360 = vcosq.f32 %v1632_v11  ;;  %v986_v55 = vsub.s32 0, %v3435_v44  ;;  %v1672_v56 = vshrl.u32 %v2474_v8, %v1663_v50  ;;  %v1674_v37 = vshll.u32 %v2474_v8, %v1662_v63 }
 0x1ea   : > { %2362 = vsinq.f32 %v1632_v11  ;;  %v1670_v34 = vor.u32 %v1669_v9, %v1668_v38  ;;  %v1675_v41 = vshrl.u32 %v2475_v10, %v1663_v50  ;;  %v1677_v15 = vshll.u32 %v2475_v10, %v1662_v63 }
 0x1eb   : > { %v1678_v23 = vshrl.u32 %v2476_v18, %v1663_v50  ;;  %v2073_v7 = vmin.u32 %v986_v55, %v3435_v44  ;;  %v1664_v60 = vshrl.u32 %v2471_v0, %v1663_v50  ;;  %v1673_v57 = vor.u32 %v1672_v56, %v1671_v30 }
 0x1ec   : > { %v1696_v36 = vshll.u32 %v1656_v5, 8  ;;  %v1676_v47 = vor.u32 %v1675_v41, %v1674_v37  ;;  %vm1680_vm0 = vcmp.lt.s32.totalorder %v1661_v61, 1  ;;  %v1034_v39 = vadd.s32 1, %v2076_v54 }
 0x1ed   : > { %v1679_v3 = vor.u32 %v1678_v23, %v1677_v15  ;;  %v988_v2 = vclz %v2073_v7  ;;  %vm1681_vm1 = vcmp.lt.s32.totalorder %v1661_v61, 2  ;;  %vm1682_vm2 = vcmp.lt.s32.totalorder %v1661_v61, 3 }
 0x1ee   : > { %vm1683_vm3 = vcmp.lt.s32.totalorder %v1661_v61, 4  ;;  %v1688_v32 = vsel %vm1680_vm0, %v1667_v53, %v1670_v34  ;;  %v1692_v58 = vsel %vm1680_vm0, %v1670_v34, %v1673_v57  ;;  %vm1640_vm4 = vcmp.eq.s32.totalorder %v3438_v19, 0 }
 0x1ef   : > { %v1685_v52 = vsel %vm1683_vm3, %v1673_v57, 2102212464  ;;  %v1689_v1 = vsel %vm1683_vm3, %v1676_v47, 920167782  ;;  %v2074_v31 = vadd.s32 4294967294, %v988_v2  ;;  %v1684_v35 = vsel %vm1680_vm0, %v1664_v60, %v1667_v53 }
 0x1f0   : > { %v1690_v59 = vsel %vm1682_vm2, %v1673_v57, %v1689_v1  ;;  %v1693_v20 = vsel %vm1683_vm3, %v1679_v3, 1326507024  ;;  %v1686_v21 = vsel %vm1682_vm2, %v1670_v34, %v1685_v52  ;;  %vm1035_vm5 = vcmp.gt.s32.totalorder %v1034_v39, 0 }
 0x1f1   : > { %v1691_v29 = vsel %vm1681_vm1, %v1688_v32, %v1690_v59  ;;  %v1694_v42 = vsel %vm1682_vm2, %v1676_v47, %v1693_v20  ;;  %vm2075_vm6 = vcmp.lt.s32.totalorder %v2074_v31, 0  ;;  %v976_v48 = vadd.s32 %v3387_v28, %v3385_v22 }
 0x1f2   : > { %v1695_v63 = vsel %vm1681_vm1, %v1692_v58, %v1694_v42  ;;  %v3451_v13 = vmul.u32.u64.low %v1696_v36, %v1691_v29  ;;  %v3452_v26 = vmul.u32.u64.high %v1696_v36, %v1691_v29, %v3451_v13  ;;  %v991_v33 = vsel %vm2075_vm6, 0, %v2074_v31 }
 0x1f3   : > { %v3457_v43 = vmul.u32.u64.low %v1696_v36, %v1695_v63  ;;  %v3458_v50 = vmul.u32.u64.high %v1696_v36, %v1695_v63, %v3457_v43  ;;  %v992_v25 = vsub.s32 32, %v991_v33  ;;  %v996_v17 = vsub.s32 4294967266, %v991_v33 }
 0x1f4   : > { %v1687_v12 = vsel %vm1681_vm1, %v1684_v35, %v1686_v21  ;;  %v1036_v49 = vsel %vm1035_vm5, %v1034_v39, 0  ;;  %vm1643_vm7 = vcmp.eq.s32.totalorder %v3438_v19, 2  ;;  %v993_v11 = vshll.u32 %v3435_v44, %v991_v33 }
 0x1f5   : > { %v1024_v24 = vand.u32 2147483647, %v3400_v62  ;;  %v1038_v38 = vand.u32 31, %v1036_v49  ;;  %v994_v22 = vshrl.u32 %v976_v48, %v992_v25  ;;  %v997_v28 = vadd.s32 127, %v996_v17 }
 0x1f6   : > { %v2361_v14 = vpop.eup %2360  ;;  %v1706_v30 = vadd.s32 1, %v3452_v26  ;;  %v1703_v55 = vmul.u32 %v1696_v36, %v1687_v12  ;;  %vm1705_vm8 = vc.u32 %v3458_v50, %v3451_v13  ;;  %vm1636_vm9 = vweird.f32 %v3172_v45 }
 0x1f7   : > { %v2363_v9 = vpop.eup %2362  ;;  %v1644_v5 = vxor.u32 2147483648, %v2361_v14  ;;  %v1039_v61 = vsub.s32 32, %v1038_v38  ;;  %v995_v56 = vor.u32 %v994_v22, %v993_v11  ;;  %v998_v37 = vshll.u32 %v997_v28, 23 }
 0x1f8   : > { %v1641_v54 = vxor.u32 2147483648, %v2363_v9  ;;  %v1707_v44 = vsel %vm1705_vm8, %v1706_v30, %v3452_v26  ;;  %vm1639_vm10 = vcmp.lt.s32.totalorder %v3438_v19, 2  ;;  %vm922_vm11 = vcmp.lt.s32.totalorder %v3265_v51, 0 }
 0x1f9   : > { %v1645_v53 = vsel %vm1643_vm7, %v1644_v5, %v2363_v9  ;;  %v1708_v41 = vadd.s32 %v1707_v44, %v1703_v55  ;;  %v999_v23 = vor.u32 4788187, %v998_v37  ;;  %v1031_v7 = vand.u32 8388607, %v1024_v24 }
 0x1fa   : > { %v1642_v34 = vsel %vm1640_vm4, %v2361_v14, %v1641_v54  ;;  %v1042_v36 = vshrl.u32 %v2472_v4, %v1039_v61  ;;  %v1045_v47 = vshrl.u32 %v2473_v6, %v1039_v61  ;;  %v1002_v3 = vcvt.s32.f32 %v995_v56 }
 0x1fb   : > { %v1646_v15 = vsel %vm1639_vm10, %v1642_v34, %v1645_v53  ;;  %v1709_v57 = vadd.s32 536870912, %v1708_v41  ;;  %v1000_v45 = vand.u32 2147483647, %v999_v23  ;;  %v1006_v19 = vsub.s32 4, %v3417_v46 }
 0x1fc   : > { %v1647_v60 = vsel %vm1636_vm9, nan, %v1646_v15  ;;  %v1041_v39 = vshll.u32 %v2471_v0, %v1038_v38  ;;  %v1044_v52 = vshll.u32 %v2472_v4, %v1038_v38  ;;  %v1048_v32 = vshrl.u32 %v2474_v8, %v1039_v61 }
 0x1fd   : > { %1764 = vst.msk [vmem:[%s2867_s6 + $0x58] sm:$0xff] %vm1752_vm15, %v1647_v60  ;;  %v3481_v2 = vshrl.u32 %v1709_v57, 30  ;;  %v1051_v1 = vshrl.u32 %v2475_v10, %v1039_v61  ;;  %v1003_v58 = vmul.f32 %v1002_v3, %v1000_v45  ;;  %v1037_v31 = vshrl.u32 %v1036_v49, 5 }
 0x1fe   : > { %v1050_v35 = vshll.u32 %v2474_v8, %v1038_v38  ;;  %v1054_v59 = vshrl.u32 %v2476_v18, %v1039_v61  ;;  %v1043_v21 = vor.u32 %v1042_v36, %v1041_v39  ;;  %v1046_v29 = vor.u32 %v1045_v47, %v1044_v52 }
 0x1ff   : > { %v1711_v20 = vshll.u32 %v3481_v2, 30  ;;  %v1047_v42 = vshll.u32 %v2473_v6, %v1038_v38  ;;  %vm3492_vm12 = vcmp.le.f32.partialorder %v920_v27, 0.7853982  ;;  %v1004_v63 = vxor.u32 2147483648, %v1003_v58 }
 0x200   : > { %v1052_v26 = vor.u32 %v1051_v1, %v1050_v35  ;;  %v1053_v48 = vshll.u32 %v2475_v10, %v1038_v38  ;;  %v1007_v8 = vsel %vm922_vm11, %v1006_v19, %v3417_v46  ;;  %v1032_v33 = vor.u32 8388608, %v1031_v7 }
 0x201   : > { %v1712_v18 = vsub.s32 %v1708_v41, %v1711_v20  ;;  %v1049_v43 = vor.u32 %v1048_v32, %v1047_v42  ;;  %v1005_v6 = vsel %vm922_vm11, %v1004_v63, %v1003_v58  ;;  %v1040_v25 = vshrl.u32 %v2471_v0, %v1039_v61 }
 0x202   : > { %v1055_v27 = vor.u32 %v1054_v59, %v1053_v48  ;;  %vm1056_vm13 = vcmp.lt.s32.totalorder %v1037_v31, 1  ;;  %v1008_v17 = vsel %vm3492_vm12, %v3265_v51, %v1005_v6  ;;  %vm1059_vm14 = vcmp.lt.s32.totalorder %v1037_v31, 4 }
 0x203   : > { %v1714_v12 = vsub.s32 0, %v1712_v18  ;;  %v1064_v10 = vsel %vm1056_vm13, %v1043_v21, %v1046_v29  ;;  %2364 = vcosq.f32 %v1008_v17  ;;  %vm1057_vm0 = vcmp.lt.s32.totalorder %v1037_v31, 2 }
 0x204   : > { %vm1058_vm1 = vcmp.lt.s32.totalorder %v1037_v31, 3  ;;  %v1065_v46 = vsel %vm1059_vm14, %v1052_v26, 920167782  ;;  %2366 = vsinq.f32 %v1008_v17  ;;  %v1061_v14 = vsel %vm1059_vm14, %v1049_v43, 2102212464 }
 0x205   : > { %v2101_v49 = vmin.u32 %v1714_v12, %v1712_v18  ;;  %v1066_v11 = vsel %vm1058_vm1, %v1049_v43, %v1065_v46  ;;  %v1068_v38 = vsel %vm1056_vm13, %v1046_v29, %v1049_v43  ;;  %v1069_v9 = vsel %vm1059_vm14, %v1055_v27, 1326507024 }
 0x206   : > { %v1067_v0 = vsel %vm1057_vm0, %v1064_v10, %v1066_v11  ;;  %v1072_v5 = vshll.u32 %v1032_v33, 8  ;;  %v1009_v22 = vsel %vm3492_vm12, 0, %v1007_v8  ;;  %v1060_v30 = vsel %vm1056_vm13, %v1040_v25, %v1043_v21 }
 0x207   : > { %v1716_v28 = vclz %v2101_v49  ;;  %v1062_v54 = vsel %vm1058_vm1, %v1046_v29, %v1061_v14  ;;  %v1070_v55 = vsel %vm1058_vm1, %v1052_v26, %v1069_v9  ;;  %v1013_v44 = vadd.s32 3, %v1009_v22 }
 0x208   : > { %v3512_v61 = vmul.u32.u64.low %v1072_v5, %v1067_v0  ;;  %v3513_v53 = vmul.u32.u64.high %v1072_v5, %v1067_v0, %v3512_v61  ;;  %v1071_v37 = vsel %vm1057_vm0, %v1068_v38, %v1070_v55  ;;  %v1063_v15 = vsel %vm1057_vm0, %v1060_v30, %v1062_v54 }
 0x209   : > { %v2102_v56 = vadd.s32 4294967294, %v1716_v28  ;;  %v3516_v34 = vmul.u32.u64.low %v1072_v5, %v1071_v37  ;;  %v3517_v41 = vmul.u32.u64.high %v1072_v5, %v1071_v37, %v3516_v34  ;;  %v1704_v60 = vadd.s32 %v3451_v13, %v3458_v50 }
 0x20a   : > { %v1082_v7 = vadd.s32 1, %v3513_v53  ;;  %v1014_v47 = vand.u32 3, %v1013_v44  ;;  %v1079_v45 = vmul.u32 %v1072_v5, %v1063_v15  ;;  %vm1012_vm7 = vweird.f32 %v3265_v51 }
 0x20b   : > { %vm2103_vm2 = vcmp.lt.s32.totalorder %v2102_v56, 0  ;;  %vm1081_vm3 = vc.u32 %v3517_v41, %v3512_v61  ;;  %vm1650_vm8 = vcmp.lt.s32.totalorder %v3368_v40, 0  ;;  %v1734_v6 = vsub.s32 4, %v3481_v2 }
 0x20c   : > { %v1719_v23 = vsel %vm2103_vm2, 0, %v2102_v56  ;;  %v1083_v52 = vsel %vm1081_vm3, %v1082_v7, %v3513_v53  ;;  %vm1019_vm4 = vcmp.eq.s32.totalorder %v1014_v47, 2  ;;  %vm1016_vm5 = vcmp.eq.s32.totalorder %v1014_v47, 0 }
 0x20d   : > { %v1720_v57 = vsub.s32 32, %v1719_v23  ;;  %v1724_v36 = vsub.s32 4294967266, %v1719_v23  ;;  %v1721_v3 = vshll.u32 %v1712_v18, %v1719_v23  ;;  %v1084_v32 = vadd.s32 %v1083_v52, %v1079_v45 }
 0x20e   : > { %vm1015_vm6 = vcmp.lt.s32.totalorder %v1014_v47, 2  ;;  %vm1649_vm9 = vcmp.le.f32.partialorder %v1648_v16, 0.7853982  ;;  %v1735_v12 = vsel %vm1650_vm8, %v1734_v6, %v3481_v2  ;;  %v1080_v0 = vadd.s32 %v3512_v61, %v3517_v41 }
 0x20f   : > { %v1722_v19 = vshrl.u32 %v1704_v60, %v1720_v57  ;;  %v1725_v39 = vadd.s32 127, %v1724_v36  ;;  %v1085_v20 = vadd.s32 536870912, %v1084_v32  ;;  %v1737_v49 = vsel %vm1649_vm9, 0, %v1735_v12 }
 0x210   : > { %v2365_v1 = vpop.eup %2364  ;;  %v1741_v11 = vadd.s32 3, %v1737_v49  ;;  %vm1740_vm14 = vweird.f32 %v3368_v40  ;;  %vm1026_vm0 = vcmp.lt.s32.totalorder %v3400_v62, 0  ;;  %vm1025_vm1 = vcmp.le.f32.partialorder %v1024_v24, 0.7853982 }
 0x211   : > { %v1723_v58 = vor.u32 %v1722_v19, %v1721_v3  ;;  %v1726_v31 = vshll.u32 %v1725_v39, 23  ;;  %v2367_v35 = vpop.eup %2366  ;;  %v1020_v59 = vxor.u32 2147483648, %v2365_v1  ;;  %v3525_v29 = vshrl.u32 %v1085_v20, 30 }
 0x212   : > { %v1017_v13 = vxor.u32 2147483648, %v2367_v35  ;;  %v1742_v28 = vand.u32 3, %v1741_v11 }
 0x213   : > { %v1727_v50 = vor.u32 4788187, %v1726_v31  ;;  %v1021_v21 = vsel %vm1019_vm4, %v1020_v59, %v2367_v35  ;;  %v1730_v63 = vcvt.s32.f32 %v1723_v58  ;;  %v1087_v48 = vshll.u32 %v3525_v29, 30 }
 0x214   : > { %v1018_v42 = vsel %vm1016_vm5, %v2365_v1, %v1017_v13  ;;  %vm1747_vm11 = vcmp.eq.s32.totalorder %v1742_v28, 2  ;;  %vm1744_vm12 = vcmp.eq.s32.totalorder %v1742_v28, 0  ;;  %vm1743_vm13 = vcmp.lt.s32.totalorder %v1742_v28, 2 }
 0x215   : > { %v1728_v4 = vand.u32 2147483647, %v1727_v50  ;;  %v1022_v26 = vsel %vm1015_vm6, %v1018_v42, %v1021_v21  ;;  %v1088_v33 = vsub.s32 %v1084_v32, %v1087_v48  ;;  %v1110_v57 = vsub.s32 4, %v3525_v29 }
 0x216   : > { %v1023_v8 = vsel %vm1012_vm7, nan, %v1022_v26  ;;  %vm1116_vm5 = vweird.f32 %v3400_v62 }
 0x217   : > { %v1731_v18 = vmul.f32 %v1730_v63, %v1728_v4  ;;  %1758 = vst.msk [vmem:[%s2867_s6 + $0x28] sm:$0xff] %vm1752_vm15, %v1023_v8  ;;  %v1090_v25 = vsub.s32 0, %v1088_v33  ;;  %v1111_v45 = vsel %vm1026_vm0, %v1110_v57, %v3525_v29 }
 0x219   : > { %v1732_v43 = vxor.u32 2147483648, %v1731_v18  ;;  %v2077_v17 = vmin.u32 %v1090_v25, %v1088_v33 }
 0x21b   : > { %v1733_v27 = vsel %vm1650_vm8, %v1732_v43, %v1731_v18  ;;  %v1092_v10 = vclz %v2077_v17 }
 0x21c   : > { %v1736_v51 = vsel %vm1649_vm9, %v3368_v40, %v1733_v27  ;;  %v1113_v40 = vsel %vm1025_vm1, 0, %v1111_v45 }
 0x21d   : > { %2368 = vcosq.f32 %v1736_v51  ;;  %v2078_v46 = vadd.s32 4294967294, %v1092_v10  ;;  %v1117_v3 = vadd.s32 3, %v1113_v40 }
 0x21e   : > { %2370 = vsinq.f32 %v1736_v51 }
 0x21f   : > { %vm2079_vm10 = vcmp.lt.s32.totalorder %v2078_v46, 0  ;;  %v1118_v19 = vand.u32 3, %v1117_v3 }
 0x220   : > { %v1095_v14 = vsel %vm2079_vm10, 0, %v2078_v46 }
 0x221   : > { %v1096_v38 = vsub.s32 32, %v1095_v14  ;;  %v1100_v9 = vsub.s32 4294967266, %v1095_v14  ;;  %v1097_v5 = vshll.u32 %v1088_v33, %v1095_v14  ;;  %vm1123_vm2 = vcmp.eq.s32.totalorder %v1118_v19, 2 }
 0x222   : > { %vm1120_vm3 = vcmp.eq.s32.totalorder %v1118_v19, 0  ;;  %vm1119_vm4 = vcmp.lt.s32.totalorder %v1118_v19, 2 }
 0x223   : > { %v1098_v16 = vshrl.u32 %v1080_v0, %v1096_v38  ;;  %v1101_v22 = vadd.s32 127, %v1100_v9 }
 0x225   : > { %v1099_v30 = vor.u32 %v1098_v16, %v1097_v5  ;;  %v1102_v54 = vshll.u32 %v1101_v22, 23 }
 0x227   : > { %v1103_v53 = vor.u32 4788187, %v1102_v54  ;;  %v1106_v34 = vcvt.s32.f32 %v1099_v30 }
 0x229   : > { %v1104_v44 = vand.u32 2147483647, %v1103_v53 }
 0x22a   : > { %v2369_v55 = vpop.eup %2368 }
 0x22b   : > { %v2371_v2 = vpop.eup %2370  ;;  %v1748_v56 = vxor.u32 2147483648, %v2369_v55  ;;  %v1107_v41 = vmul.f32 %v1106_v34, %v1104_v44 }
 0x22c   : > { %v1745_v37 = vxor.u32 2147483648, %v2371_v2 }
 0x22d   : > { %v1749_v15 = vsel %vm1747_vm11, %v1748_v56, %v2371_v2  ;;  %v1108_v60 = vxor.u32 2147483648, %v1107_v41 }
 0x22e   : > { %v1746_v61 = vsel %vm1744_vm12, %v2369_v55, %v1745_v37 }
 0x22f   : > { %v1750_v23 = vsel %vm1743_vm13, %v1746_v61, %v1749_v15  ;;  %v1109_v36 = vsel %vm1026_vm0, %v1108_v60, %v1107_v41 }
 0x230   : > { %v1751_v7 = vsel %vm1740_vm14, nan, %v1750_v23  ;;  %v1112_v47 = vsel %vm1025_vm1, %v3400_v62, %v1109_v36 }
 0x231   : > { %1765 = vst.msk [vmem:[%s2867_s6 + $0x60] sm:$0xff] %vm1752_vm15, %v1751_v7  ;;  %2372 = vcosq.f32 %v1112_v47 }
 0x232   : > { %2374 = vsinq.f32 %v1112_v47 }
 0x23e   : > { %v2373_v39 = vpop.eup %2372 }
 0x23f   : > { %v2375_v52 = vpop.eup %2374  ;;  %v1124_v32 = vxor.u32 2147483648, %v2373_v39 }
 0x240   : > { %v1121_v1 = vxor.u32 2147483648, %v2375_v52 }
 0x241   : > { %v1125_v58 = vsel %vm1123_vm2, %v1124_v32, %v2375_v52  ;;  %1772 = sbr.rel (!%p2522_p4) target bundleno = 635 (0x27b), region = 36 }
 0x242   : > { %v1122_v24 = vsel %vm1120_vm3, %v2373_v39, %v1121_v1 }
 0x243   : > { %v1126_v31 = vsel %vm1119_vm4, %v1122_v24, %v1125_v58 }
 0x244   : > { %v1127_v35 = vsel %vm1116_vm5, nan, %v1126_v31 }
 0x245   : > { %1759 = vst.msk [vmem:[%s2867_s6 + $0x30] sm:$0xff] %vm1752_vm15, %v1127_v35 }
 0x246   : > { %s3673_s9 = smov (!%p1775_p8, %s1774_s9), 13 }
 0x247   : > { %s2104_s17 = sshll.u32 %s3673_s9, 7 }
 0x248   : > { %p2107_p9 = scmp.eq.s32.totalorder %s2104_s17, 0 }
 0x249   : > { %2377 = sdivrem.u32 (!%p2107_p9), %s3673_s9, 13 }
 0x24a   : > { %1783 = sbr.rel (%p2107_p9) target bundleno = 635 (0x27b), region = 40 }
 0x252   : > { %s3563_s18 = spop.drf %2377 }
 0x253   : > { %p2108_p10 = scmp.le.s32.totalorder %s3563_s18, 0 }
 0x254   : > { %s3666_s15 = smov (!%p2108_p10), %s3557_s14  ;;  %s3667_s20 = smov (!%p2108_p10), %s2867_s6 }
 0x255   : > { %1988 = sbr.rel (%p2108_p10) target bundleno = 610 (0x262), region = 116  ;;  %s3572_s21 = smov (!%p2108_p10), 0  }
 0x256   : > { %s3574_s22 = smov (!%p2108_p10), 0  }
 0x25a LB: >> { %v1872_v62 = vld [vmem:[%s2443_s20] sm:$0xff]  ;;  %v1874_v59 = vld [vmem:[%s2443_s20 + $0x8] sm:$0xff]  ;;  %v1876_v20 = vld [vmem:[%s2443_s20 + $0x10] sm:$0xff]  ;;  %s1898_s23 = sadd.s32 1, %s2447_s21  ;;  %s1866_s22 = sadd.s32 1, %s2451_s22   ;;  %s2451_s22 = sphi %s3574_s22, %s1866_s22   ;;  %s2447_s21 = sphi %s3572_s21, %s3668_s21   ;;  %s2443_s20 = sphi %s3667_s20, %s1903_s20   ;;  %s2439_s15 = sphi %s3666_s15, %s1904_s15  }
 0x25b   : >> { %1873 = vst [vmem:[%s2439_s15] sm:$0xff] %v1872_v62  ;;  %1875 = vst [vmem:[%s2439_s15 + $0x8] sm:$0xff] %v1874_v59  ;;  %v1878_v13 = vld [vmem:[%s2443_s20 + $0x18] sm:$0xff]  ;;  %v1880_v50 = vld [vmem:[%s2443_s20 + $0x20] sm:$0xff]  ;;  %p1899_p11 = scmp.ge.s32.totalorder %s1898_s23, %s3563_s18  ;;  %p1865_p12 = scmp.ge.s32.totalorder %s1866_s22, %s3563_s18 }
 0x25c   : >> { %1877 = vst [vmem:[%s2439_s15 + $0x10] sm:$0xff] %v1876_v20  ;;  %v1882_v21 = vld [vmem:[%s2443_s20 + $0x28] sm:$0xff]  ;;  %1879 = vst [vmem:[%s2439_s15 + $0x18] sm:$0xff] %v1878_v13  ;;  %v1884_v29 = vld [vmem:[%s2443_s20 + $0x30] sm:$0xff] }
 0x25d   : >> { %1881 = vst [vmem:[%s2439_s15 + $0x20] sm:$0xff] %v1880_v50  ;;  %1883 = vst [vmem:[%s2439_s15 + $0x28] sm:$0xff] %v1882_v21  ;;  %v1886_v42 = vld [vmem:[%s2443_s20 + $0x38] sm:$0xff]  ;;  %v1888_v4 = vld [vmem:[%s2443_s20 + $0x40] sm:$0xff]  ;;  %s3675_s23 = smov (%p1899_p11, %s1898_s23), 0  ;;  %1868 = sbr.rel (!%p1865_p12) target bundleno = 602 (0x25a), region = 122 }
 0x25e   : >> { %1885 = vst [vmem:[%s2439_s15 + $0x30] sm:$0xff] %v1884_v29  ;;  %1887 = vst [vmem:[%s2439_s15 + $0x38] sm:$0xff] %v1886_v42  ;;  %v1890_v63 = vld [vmem:[%s2443_s20 + $0x48] sm:$0xff]  ;;  %v1892_v26 = vld [vmem:[%s2443_s20 + $0x50] sm:$0xff]  ;;  %s1901_s24 = smul.u32 104, %s3675_s23  ;;  %s3668_s21 = smov %s3675_s23 }
 0x25f   : >> { %1889 = vst [vmem:[%s2439_s15 + $0x40] sm:$0xff] %v1888_v4  ;;  %v1894_v48 = vld [vmem:[%s2443_s20 + $0x58] sm:$0xff]  ;;  %1891 = vst [vmem:[%s2439_s15 + $0x48] sm:$0xff] %v1890_v63  ;;  %v1896_v8 = vld [vmem:[%s2443_s20 + $0x60] sm:$0xff] }
 0x260   : >> { %1893 = vst [vmem:[%s2439_s15 + $0x50] sm:$0xff] %v1892_v26  ;;  %1895 = vst [vmem:[%s2439_s15 + $0x58] sm:$0xff] %v1894_v48  ;;  %s1903_s20 = scalar_lea.vmem %s2867_s6, %s1901_s24 [#allocation2]  }
 0x261   : >> { %1897 = vst [vmem:[%s2439_s15 + $0x60] sm:$0xff] %v1896_v8  ;;  %s1904_s15 = scalar_lea.vmem %s3557_s14, %s1901_s24  }
 0x262 PF: > { %2379 = sdivrem.u32 %s3673_s9, 13 }
 0x263   : > { %s2109_s25 = smul.u32 104, %s3563_s18 }
 0x265   : > { %s1909_s26 = scalar_lea.vmem %s2867_s6, %s2109_s25 [#allocation2]   ;;  %s1911_s27 = scalar_lea.vmem %s3557_s14, %s2109_s25  }
 0x26b   : > { %s2380_s28 = spop.drf %2379 }
 0x26c   : > { %p2111_p13 = scmp.le.s32.totalorder %s2380_s28, 0 }
 0x26d   : > { %s2453_s29 = smov (!%p2111_p13), %s1911_s27   ;;  %s2457_s30 = smov (!%p2111_p13), %s1909_s26  }
 0x26e   : > { %2002 = sbr.rel (%p2111_p13) target bundleno = 635 (0x27b), region = 127  ;;  %s2461_s4 = smov (!%p2111_p13), 0  }
 0x26f   : > { %s2465_s5 = smov (!%p2111_p13), 0  }
 0x273 LB: >> { %v1921_v18 = vld [vmem:[%s2459_s30] sm:$0xff]  ;;  %s1923_s7 = sadd.s32 1, %s2463_s4  ;;  %s1915_s5 = sadd.s32 1, %s2467_s5   ;;  %s2467_s5 = sphi %s2465_s5, %s1915_s5   ;;  %s2463_s4 = sphi %s2461_s4, %s2462_s4   ;;  %s2459_s30 = sphi %s2457_s30, %s1928_s30   ;;  %s2455_s29 = sphi %s2453_s29, %s1929_s29  }
 0x274   : >> { %1922 = vst [vmem:[%s2455_s29] sm:$0xff] %v1921_v18  ;;  %p1924_p0 = scmp.ge.s32.totalorder %s1923_s7, %s2380_s28  ;;  %p1914_p1 = scmp.ge.s32.totalorder %s1915_s5, %s2380_s28 }
 0x276   : >> { %s3677_s7 = smov (%p1924_p0, %s1923_s7), 0  ;;  %1917 = sbr.rel (!%p1914_p1) target bundleno = 627 (0x273), region = 133 }
 0x277   : >> { %s2112_s6 = sshll.u32 %s3677_s7, 3  ;;  %s2462_s4 = smov %s3677_s7  }
 0x278   : >> { %s1928_s30 = scalar_lea.vmem %s1909_s26, %s2112_s6 [#allocation2]   ;;  %s1929_s29 = scalar_lea.vmem %s1911_s27, %s2112_s6  }
 0x27b PF: > { %p10_p2 = scmp.ge.s32.totalorder %s2512_s16, 4   ;;  %s3669_s12 = smov %s2431_s13 }
 0x27c   : > { %s3670_s13 = smov %s2520_s19  ;;  %s3671_s14 = smov %s2512_s16 }
 0x27d   :  { %12 = sbr.rel (!%p10_p2) target bundleno = 2 (0x2), region = 144 }

</bundles_post_ra>
